<compile_context>
chip_gen: v7x
topology: tpu7x:2x2x1
jax: 0.10.0
libtpu: 0.0.40
codegen_flags: <defaults>
</compile_context>

<pallas_src>
import math
from functools import partial

import jax
import jax.numpy as jnp
from jax.experimental import pallas as pl
from jax.experimental.pallas import tpu as pltpu

# ----------------------------- model config ---------------------------------
VOCAB = 64
D_MODEL = 32
N_HEADS = 4
HEAD_DIM = D_MODEL // N_HEADS
D_FF = 64
N_LAYERS = 2
REL_BUCKETS = 32
REL_MAX_DIST = 128
LN_EPS = 1e-6


# ----------------------------- Pallas kernel ---------------------------------
def fid_encoder_kernel(x_ref, mask_ref, bias_ref,
                       ln1_ref, wqkv_ref, wo_ref,
                       ln2_ref, wi_ref, wff_ref, lnf_ref,
                       o_ref):
    """Fused T5 encoder stack (all layers + final RMSNorm) for one chunk of
    passages.

    x_ref    : (Bb*L, D)      f32  embedded tokens, row = (passage, position)
    mask_ref : (Bb, 1, L)     f32  attention mask (1 = keep, 0 = pad)
    bias_ref : (H, L, L)      f32  relative-position bias (shared by all layers)
    ln1/ln2  : (NL, 1, D)     f32  RMSNorm scales;   lnf_ref : (1, D)
    wqkv     : (NL, D, 3D)    bf16 fused [Wq | Wk | Wv]
    wo       : (NL, D, D)     bf16
    wi : (NL, D, Dff) bf16 ;  wff : (NL, Dff, D) bf16
    o_ref    : (Bb, L, D)     f32  last_hidden_state for this chunk
    """
    BL, D = x_ref.shape                    # BL = Bb * L
    Bb = mask_ref.shape[0]
    L = mask_ref.shape[2]
    H = bias_ref.shape[0]
    dh = D // H
    NL = wqkv_ref.shape[0]

    x = x_ref[...]                                               # (BL, D) f32

    # Additive attention bias shared by every layer:
    #   relative-position bias + key-padding mask, hoisted out of the loop and
    #   pre-flattened to the (Bb*H, L, L) score layout (no per-layer reshapes).
    maskb = (1.0 - mask_ref[...]) * jnp.float32(-1e9)            # (Bb, 1, L)
    attn_bias = (bias_ref[...][None, :, :, :]
                 + maskb[:, None, :, :]).reshape(Bb * H, L, L)   # (Bb*H, L, L)

    def rmsnorm(z, w):                                           # f32 math
        var = jnp.mean(z * z, axis=-1, keepdims=True)
        return z * jax.lax.rsqrt(var + LN_EPS) * w

    def split_heads(t):                    # (BL, D) -> (Bb*H, L, dh)
        return (t.reshape(Bb, L, H, dh)
                 .transpose(0, 2, 1, 3)
                 .reshape(Bb * H, L, dh))

    for li in range(NL):                   # static, unrolled layer loop
        # ---- self-attention sublayer: RMSNorm -> MHA -> residual ------------
        hb = rmsnorm(x, ln1_ref[li]).astype(jnp.bfloat16)        # (BL, D)
        qkv = jnp.dot(hb, wqkv_ref[li],
                      preferred_element_type=jnp.float32)        # (BL, 3D)
        q = qkv[:, 0:D]
        k = qkv[:, D:2 * D]
        v = qkv[:, 2 * D:3 * D]

        qh = split_heads(q).astype(jnp.bfloat16)                 # (Bb*H, L, dh)
        kh = split_heads(k).astype(jnp.bfloat16)
        vh = split_heads(v).astype(jnp.bfloat16)

        # T5 attention: no 1/sqrt(dh) scaling (folded into the weight init).
        s = jnp.einsum('bqd,bkd->bqk', qh, kh,
                       preferred_element_type=jnp.float32)       # (Bb*H, L, L)
        s = s + attn_bias
        s = s - jnp.max(s, axis=-1, keepdims=True)
        p = jnp.exp(s)
        p = p * pl.reciprocal(jnp.sum(p, axis=-1, keepdims=True), approx=True)
        p = p.astype(jnp.bfloat16)

        ctx = jnp.einsum('bqk,bkd->bqd', p, vh,
                         preferred_element_type=jnp.float32)     # (Bb*H, L, dh)
        ctx = (ctx.reshape(Bb, H, L, dh)
                  .transpose(0, 2, 1, 3)
                  .reshape(BL, D)).astype(jnp.bfloat16)
        x = x + jnp.dot(ctx, wo_ref[li], preferred_element_type=jnp.float32)

        # ---- feed-forward sublayer: RMSNorm -> ReLU MLP -> residual ---------
        h2 = rmsnorm(x, ln2_ref[li]).astype(jnp.bfloat16)
        ff = jnp.maximum(
            jnp.dot(h2, wi_ref[li], preferred_element_type=jnp.float32), 0.0)
        x = x + jnp.dot(ff.astype(jnp.bfloat16), wff_ref[li],
                        preferred_element_type=jnp.float32)

    # ---- final RMSNorm; single contiguous multi-row slab store ---------------
    # (At real T5 widths D >= 512 this store is already lane-dense.)
    o_ref[...] = rmsnorm(x, lnf_ref[...]).reshape(Bb, L, D)


# --------------------------- plain-JAX glue -----------------------------------
def relative_position_bucket(relative_position, num_buckets=REL_BUCKETS,
                             max_distance=REL_MAX_DIST):
    # bidirectional=True (encoder)
    num_buckets //= 2
    relative_buckets = (relative_position > 0).astype(jnp.int32) * num_buckets
    relative_position = jnp.abs(relative_position)
    max_exact = num_buckets // 2
    is_small = relative_position < max_exact
    rp_safe = jnp.maximum(relative_position, 1).astype(jnp.float32)
    rel_if_large = max_exact + (
        jnp.log(rp_safe / max_exact)
        / math.log(max_distance / max_exact) * (num_buckets - max_exact)
    ).astype(jnp.int32)
    rel_if_large = jnp.minimum(rel_if_large, num_buckets - 1)
    relative_buckets += jnp.where(is_small, relative_position, rel_if_large)
    return relative_buckets


def compute_position_bias(rel_bias_table, L):
    ctx = jnp.arange(L, dtype=jnp.int32)[:, None]
    mem = jnp.arange(L, dtype=jnp.int32)[None, :]
    buckets = relative_position_bucket(mem - ctx)                # (L, L)
    bias = rel_bias_table[buckets]                               # (L, L, H)
    return jnp.transpose(bias, (2, 0, 1)).astype(jnp.float32)    # (H, L, L)


def encoder_forward(params, input_ids, attention_mask):
    """Fused T5 encoder over (Bp, L) passages. Returns (Bp, L, D)."""
    Bp, L = input_ids.shape
    D, H, Dff, NL = D_MODEL, N_HEADS, D_FF, N_LAYERS

    # Embedding gather and the relative-position bucket table stay in plain JAX.
    x = params['embedding'][input_ids].reshape(Bp * L, D)        # (Bp*L, D) f32
    mask = attention_mask.astype(jnp.float32).reshape(Bp, 1, L)  # (Bp, 1, L)
    pos_bias = compute_position_bias(params['rel_bias'], L)      # (H, L, L)

    # Two "parallel" chunks so both v7x TensorCores get work; a single cheap
    # extra grid step on v5e/v6e (1 TC). Blocks stay as large as possible.
    n_chunks = 2 if Bp % 2 == 0 else 1
    Bb = Bp // n_chunks

    def wfull(shape):                       # whole-array (shared) block
        n = len(shape)
        return pl.BlockSpec(shape, lambda i, n=n: (0,) * n)

    # Advisory cost hint for XLA's scheduler around the fused call.
    flops_per_layer = (2 * Bp * L * D * (3 * D)        # fused QKV
                       + 2 * (2 * Bp * H * L * L * (D // H))  # scores + ctx
                       + 2 * Bp * L * D * D            # wo
                       + 2 * (2 * Bp * L * D * Dff))   # wi + wff
    weight_bytes = sum(int(params[k].size) * params[k].dtype.itemsize
                       for k in ('ln1', 'wqkv', 'wo', 'ln2', 'wi', 'wff',
                                 'final_ln'))
    cost = pl.CostEstimate(
        flops=int(NL * flops_per_layer),
        transcendentals=int(NL * Bp * H * L * L + (2 * NL + 1) * Bp * L),
        bytes_accessed=int(2 * Bp * L * D * 4 + Bp * L * 4
                           + H * L * L * 4 + weight_bytes))

    out = pl.pallas_call(
        fid_encoder_kernel,
        out_shape=jax.ShapeDtypeStruct((Bp, L, D), jnp.float32),
        grid=(n_chunks,),
        in_specs=[
            pl.BlockSpec((Bb * L, D), lambda i: (i, 0)),         # x (chunked rows)
            pl.BlockSpec((Bb, 1, L), lambda i: (i, 0, 0)),       # mask (chunked)
            wfull((H, L, L)),                                    # position bias
            wfull((NL, 1, D)),                                   # ln1 (stacked)
            wfull((NL, D, 3 * D)),                               # wqkv (fused)
            wfull((NL, D, D)),                                   # wo
            wfull((NL, 1, D)),                                   # ln2
            wfull((NL, D, Dff)), wfull((NL, Dff, D)),            # wi, wff
            wfull((1, D)),                                       # final ln
        ],
        out_specs=pl.BlockSpec((Bb, L, D), lambda i: (i, 0, 0)),
        compiler_params=pltpu.CompilerParams(
            dimension_semantics=("parallel",)),
        cost_estimate=cost,
    )(x, mask, pos_bias,
      params['ln1'], params['wqkv'], params['wo'],
      params['ln2'], params['wi'], params['wff'], params['final_ln'])
    return out


def encoder_wrapper_forward(params, input_ids, attention_mask, n_passages):
    """Exact semantics of EncoderWrapper.forward."""
    bsz, total_length = input_ids.shape
    passage_length = total_length // n_passages
    input_ids = input_ids.reshape(bsz * n_passages, passage_length)
    attention_mask = attention_mask.reshape(bsz * n_passages, passage_length)
    last_hidden_state = encoder_forward(params, input_ids, attention_mask)
    # outputs.last_hidden_state.view(bsz, n_passages * passage_length, -1)
    return last_hidden_state.reshape(bsz, n_passages * passage_length, -1)


# ----------------------------- parameter init --------------------------------
def init_params(key):
    ks = jax.random.split(key, 2 + N_LAYERS * 6)
    it = iter(ks)
    norm = lambda k, shape, scale: (scale * jax.random.normal(k, shape)
                                    ).astype(jnp.float32)
    emb = norm(next(it), (VOCAB, D_MODEL), 1.0)
    rel = norm(next(it), (REL_BUCKETS, N_HEADS), 0.1)

    wqkv, wo, wi, wff = [], [], [], []
    for _ in range(N_LAYERS):
        wq = norm(next(it), (D_MODEL, D_MODEL), (D_MODEL * HEAD_DIM) ** -0.5)
        wk = norm(next(it), (D_MODEL, D_MODEL), D_MODEL ** -0.5)
        wv = norm(next(it), (D_MODEL, D_MODEL), D_MODEL ** -0.5)
        wqkv.append(jnp.concatenate([wq, wk, wv], axis=1))       # (D, 3D)
        wo.append(norm(next(it), (D_MODEL, D_MODEL), (N_HEADS * HEAD_DIM) ** -0.5))
        wi.append(norm(next(it), (D_MODEL, D_FF), D_MODEL ** -0.5))
        wff.append(norm(next(it), (D_FF, D_MODEL), D_FF ** -0.5))

    return {
        'embedding': emb,
        'rel_bias': rel,
        'ln1': jnp.ones((N_LAYERS, 1, D_MODEL), jnp.float32),
        'ln2': jnp.ones((N_LAYERS, 1, D_MODEL), jnp.float32),
        'final_ln': jnp.ones((1, D_MODEL), jnp.float32),
        # matmul weights stacked on a layer axis and stored bf16 for the MXU
        'wqkv': jnp.stack(wqkv).astype(jnp.bfloat16),
        'wo': jnp.stack(wo).astype(jnp.bfloat16),
        'wi': jnp.stack(wi).astype(jnp.bfloat16),
        'wff': jnp.stack(wff).astype(jnp.bfloat16),
    }


# ---------------------------------- main --------------------------------------
if __name__ == "__main__":
    key = jax.random.PRNGKey(0)
    pkey, ikey = jax.random.split(key)
    params = init_params(pkey)

    bsz, n_passages, passage_length = 2, 2, 8
    total_length = n_passages * passage_length
    input_ids = jax.random.randint(ikey, (bsz, total_length), 0, VOCAB,
                                   dtype=jnp.int32)
    attention_mask = jnp.ones((bsz, total_length), jnp.float32)
    # non-trivial mask: pad out the tail of the first passage of batch 1
    attention_mask = attention_mask.at[1, passage_length - 2:passage_length].set(0.0)

    fwd = jax.jit(partial(encoder_wrapper_forward, n_passages=n_passages))
    out = fwd(params, input_ids, attention_mask)
    jax.block_until_ready(out)

    assert out.shape == (bsz, n_passages * passage_length, D_MODEL), out.shape
    assert bool(jnp.all(jnp.isfinite(out)))
    print("KERNEL_OK")
</pallas_src>

<mosaic_0001>
module attributes {stable_mosaic.version = 11 : i64} {
  func.func @fid_encoder_kernel(%arg0: i32, %arg1: memref<16x32xf32, #tpu.memory_space<vmem>>, %arg2: memref<2x1x8xf32, #tpu.memory_space<vmem>>, %arg3: memref<4x8x8xf32, #tpu.memory_space<vmem>>, %arg4: memref<2x1x32xf32, #tpu.memory_space<vmem>>, %arg5: memref<2x32x96xbf16, #tpu.memory_space<vmem>>, %arg6: memref<2x32x32xbf16, #tpu.memory_space<vmem>>, %arg7: memref<2x1x32xf32, #tpu.memory_space<vmem>>, %arg8: memref<2x32x64xbf16, #tpu.memory_space<vmem>>, %arg9: memref<2x64x32xbf16, #tpu.memory_space<vmem>>, %arg10: memref<1x32xf32, #tpu.memory_space<vmem>>, %arg11: memref<2x8x32xf32, #tpu.memory_space<vmem>>) attributes {dimension_semantics = [#tpu.dimension_semantics<parallel>], iteration_bounds = array<i64: 2>, scalar_prefetch = 0 : i64, scratch_operands = 0 : i64, tpu.core_type = #tpu.core_type<tc>, window_params = [{transform_indices = @transform_0, window_bounds = array<i64: 16, 32>}, {transform_indices = @transform_1, window_bounds = array<i64: 2, 1, 8>}, {pipeline_mode = #tpu.pipeline_mode<synchronous>, transform_indices = @transform_2, window_bounds = array<i64: 4, 8, 8>}, {pipeline_mode = #tpu.pipeline_mode<synchronous>, transform_indices = @transform_3, window_bounds = array<i64: 2, 1, 32>}, {pipeline_mode = #tpu.pipeline_mode<synchronous>, transform_indices = @transform_4, window_bounds = array<i64: 2, 32, 96>}, {pipeline_mode = #tpu.pipeline_mode<synchronous>, transform_indices = @transform_5, window_bounds = array<i64: 2, 32, 32>}, {pipeline_mode = #tpu.pipeline_mode<synchronous>, transform_indices = @transform_6, window_bounds = array<i64: 2, 1, 32>}, {pipeline_mode = #tpu.pipeline_mode<synchronous>, transform_indices = @transform_7, window_bounds = array<i64: 2, 32, 64>}, {pipeline_mode = #tpu.pipeline_mode<synchronous>, transform_indices = @transform_8, window_bounds = array<i64: 2, 64, 32>}, {pipeline_mode = #tpu.pipeline_mode<synchronous>, transform_indices = @transform_9, window_bounds = array<i64: 1, 32>}, {transform_indices = @transform_10, window_bounds = array<i64: 2, 8, 32>}]} {
    %c0 = arith.constant 0 : index
    %c0_0 = arith.constant 0 : index
    %0 = vector.load %arg1[%c0, %c0_0] : memref<16x32xf32, #tpu.memory_space<vmem>>, vector<16x32xf32>
    %c0_1 = arith.constant 0 : index
    %c0_2 = arith.constant 0 : index
    %c0_3 = arith.constant 0 : index
    %1 = vector.load %arg2[%c0_1, %c0_2, %c0_3] : memref<2x1x8xf32, #tpu.memory_space<vmem>>, vector<2x1x8xf32>
    %cst = arith.constant 1.000000e+00 : f32
    %2 = vector.broadcast %cst : f32 to vector<2x1x8xf32>
    %3 = arith.subf %2, %1 : vector<2x1x8xf32>
    %cst_4 = arith.constant -1.000000e+09 : f32
    %4 = vector.broadcast %cst_4 : f32 to vector<2x1x8xf32>
    %5 = arith.mulf %3, %4 : vector<2x1x8xf32>
    %c0_5 = arith.constant 0 : index
    %c0_6 = arith.constant 0 : index
    %c0_7 = arith.constant 0 : index
    %6 = vector.load %arg3[%c0_5, %c0_6, %c0_7] : memref<4x8x8xf32, #tpu.memory_space<vmem>>, vector<4x8x8xf32>
    %7 = vector.shape_cast %6 : vector<4x8x8xf32> to vector<1x4x8x8xf32>
    %8 = vector.shape_cast %5 : vector<2x1x8xf32> to vector<2x1x1x8xf32>
    %9 = vector.broadcast %7 : vector<1x4x8x8xf32> to vector<2x4x8x8xf32>
    %10 = vector.broadcast %8 : vector<2x1x1x8xf32> to vector<2x4x8x8xf32>
    %11 = arith.addf %9, %10 : vector<2x4x8x8xf32>
    %12 = vector.shape_cast %11 : vector<2x4x8x8xf32> to vector<8x8x8xf32>
    %c0_8 = arith.constant 0 : index
    %c0_9 = arith.constant 0 : index
    %c0_10 = arith.constant 0 : index
    %13 = vector.load %arg4[%c0_8, %c0_9, %c0_10] : memref<2x1x32xf32, #tpu.memory_space<vmem>>, vector<1x1x32xf32>
    %14 = vector.shape_cast %13 : vector<1x1x32xf32> to vector<1x32xf32>
    %15 = arith.mulf %0, %0 : vector<16x32xf32>
    %cst_11 = arith.constant dense<0.000000e+00> : vector<16xf32>
    %16 = vector.multi_reduction <add>, %15, %cst_11 [1] : vector<16x32xf32> to vector<16xf32>
    %17 = vector.shape_cast %16 : vector<16xf32> to vector<16x1xf32>
    %cst_12 = arith.constant 3.200000e+01 : f32
    %18 = vector.broadcast %cst_12 : f32 to vector<16x1xf32>
    %19 = arith.divf %17, %18 : vector<16x1xf32>
    %cst_13 = arith.constant 9.99999997E-7 : f32
    %20 = vector.broadcast %cst_13 : f32 to vector<16x1xf32>
    %21 = arith.addf %19, %20 : vector<16x1xf32>
    %22 = math.rsqrt %21 : vector<16x1xf32>
    %23 = vector.broadcast %22 : vector<16x1xf32> to vector<16x32xf32>
    %24 = arith.mulf %0, %23 : vector<16x32xf32>
    %25 = vector.broadcast %14 : vector<1x32xf32> to vector<16x32xf32>
    %26 = arith.mulf %24, %25 : vector<16x32xf32>
    %27 = arith.truncf %26 : vector<16x32xf32> to vector<16x32xbf16>
    %c0_14 = arith.constant 0 : index
    %c0_15 = arith.constant 0 : index
    %c0_16 = arith.constant 0 : index
    %28 = vector.load %arg5[%c0_14, %c0_15, %c0_16] : memref<2x32x96xbf16, #tpu.memory_space<vmem>>, vector<1x32x96xbf16>
    %29 = vector.shape_cast %28 : vector<1x32x96xbf16> to vector<32x96xbf16>
    %cst_17 = arith.constant dense<0.000000e+00> : vector<16x96xf32>
    %30 = tpu.matmul %27, %29, %cst_17 {dimension_numbers = #tpu.dot_dimension_numbers<[1], [0], [0], [1], [0, 0, 1, 1], [], []>} : vector<16x32xbf16>, vector<32x96xbf16>, vector<16x96xf32> -> vector<16x96xf32>
    %31 = vector.extract_strided_slice %30 {offsets = [0, 0], sizes = [16, 32], strides = [1, 1]} : vector<16x96xf32> to vector<16x32xf32>
    %32 = vector.extract_strided_slice %30 {offsets = [0, 32], sizes = [16, 32], strides = [1, 1]} : vector<16x96xf32> to vector<16x32xf32>
    %33 = vector.extract_strided_slice %30 {offsets = [0, 64], sizes = [16, 32], strides = [1, 1]} : vector<16x96xf32> to vector<16x32xf32>
    %34 = vector.shape_cast %31 : vector<16x32xf32> to vector<2x8x4x8xf32>
    %35 = tpu.transpose %34, [0, 2, 1, 3] : vector<2x8x4x8xf32> -> vector<2x4x8x8xf32>
    %36 = vector.shape_cast %35 : vector<2x4x8x8xf32> to vector<8x8x8xf32>
    %37 = arith.truncf %36 : vector<8x8x8xf32> to vector<8x8x8xbf16>
    %38 = vector.shape_cast %32 : vector<16x32xf32> to vector<2x8x4x8xf32>
    %39 = tpu.transpose %38, [0, 2, 1, 3] : vector<2x8x4x8xf32> -> vector<2x4x8x8xf32>
    %40 = vector.shape_cast %39 : vector<2x4x8x8xf32> to vector<8x8x8xf32>
    %41 = arith.truncf %40 : vector<8x8x8xf32> to vector<8x8x8xbf16>
    %42 = vector.shape_cast %33 : vector<16x32xf32> to vector<2x8x4x8xf32>
    %43 = tpu.transpose %42, [0, 2, 1, 3] : vector<2x8x4x8xf32> -> vector<2x4x8x8xf32>
    %44 = vector.shape_cast %43 : vector<2x4x8x8xf32> to vector<8x8x8xf32>
    %45 = arith.truncf %44 : vector<8x8x8xf32> to vector<8x8x8xbf16>
    "tpu.trace_start"() <{level = 10 : i32, message = "bqd,bkd->bqk"}> : () -> ()
    %cst_18 = arith.constant dense<0.000000e+00> : vector<8x8x8xf32>
    %46 = tpu.matmul %37, %41, %cst_18 {dimension_numbers = #tpu.dot_dimension_numbers<[2], [2], [1], [1], [0, 0, 0, 1, 1, 1], [0], [0]>} : vector<8x8x8xbf16>, vector<8x8x8xbf16>, vector<8x8x8xf32> -> vector<8x8x8xf32>
    "tpu.trace_stop"() : () -> ()
    %47 = arith.addf %46, %12 : vector<8x8x8xf32>
    %cst_19 = arith.constant dense<0xFF800000> : vector<8x8xf32>
    %48 = vector.multi_reduction <maximumf>, %47, %cst_19 [2] : vector<8x8x8xf32> to vector<8x8xf32>
    %49 = vector.shape_cast %48 : vector<8x8xf32> to vector<8x8x1xf32>
    %50 = vector.broadcast %49 : vector<8x8x1xf32> to vector<8x8x8xf32>
    %51 = arith.subf %47, %50 : vector<8x8x8xf32>
    %52 = math.exp %51 : vector<8x8x8xf32>
    %cst_20 = arith.constant dense<0.000000e+00> : vector<8x8xf32>
    %53 = vector.multi_reduction <add>, %52, %cst_20 [2] : vector<8x8x8xf32> to vector<8x8xf32>
    %54 = vector.shape_cast %53 : vector<8x8xf32> to vector<8x8x1xf32>
    %55 = tpu.reciprocal %54 {approx = true} : vector<8x8x1xf32> -> vector<8x8x1xf32>
    %56 = vector.broadcast %55 : vector<8x8x1xf32> to vector<8x8x8xf32>
    %57 = arith.mulf %52, %56 : vector<8x8x8xf32>
    %58 = arith.truncf %57 : vector<8x8x8xf32> to vector<8x8x8xbf16>
    "tpu.trace_start"() <{level = 10 : i32, message = "bqk,bkd->bqd"}> : () -> ()
    %cst_21 = arith.constant dense<0.000000e+00> : vector<8x8x8xf32>
    %59 = tpu.matmul %58, %45, %cst_21 {dimension_numbers = #tpu.dot_dimension_numbers<[2], [1], [1], [2], [0, 0, 0, 1, 1, 2], [0], [0]>} : vector<8x8x8xbf16>, vector<8x8x8xbf16>, vector<8x8x8xf32> -> vector<8x8x8xf32>
    "tpu.trace_stop"() : () -> ()
    %60 = vector.shape_cast %59 : vector<8x8x8xf32> to vector<2x4x8x8xf32>
    %61 = tpu.transpose %60, [0, 2, 1, 3] : vector<2x4x8x8xf32> -> vector<2x8x4x8xf32>
    %62 = vector.shape_cast %61 : vector<2x8x4x8xf32> to vector<16x32xf32>
    %63 = arith.truncf %62 : vector<16x32xf32> to vector<16x32xbf16>
    %c0_22 = arith.constant 0 : index
    %c0_23 = arith.constant 0 : index
    %c0_24 = arith.constant 0 : index
    %64 = vector.load %arg6[%c0_22, %c0_23, %c0_24] : memref<2x32x32xbf16, #tpu.memory_space<vmem>>, vector<1x32x32xbf16>
    %65 = vector.shape_cast %64 : vector<1x32x32xbf16> to vector<32x32xbf16>
    %cst_25 = arith.constant dense<0.000000e+00> : vector<16x32xf32>
    %66 = tpu.matmul %63, %65, %cst_25 {dimension_numbers = #tpu.dot_dimension_numbers<[1], [0], [0], [1], [0, 0, 1, 1], [], []>} : vector<16x32xbf16>, vector<32x32xbf16>, vector<16x32xf32> -> vector<16x32xf32>
    %67 = arith.addf %0, %66 : vector<16x32xf32>
    %c0_26 = arith.constant 0 : index
    %c0_27 = arith.constant 0 : index
    %c0_28 = arith.constant 0 : index
    %68 = vector.load %arg7[%c0_26, %c0_27, %c0_28] : memref<2x1x32xf32, #tpu.memory_space<vmem>>, vector<1x1x32xf32>
    %69 = vector.shape_cast %68 : vector<1x1x32xf32> to vector<1x32xf32>
    %70 = arith.mulf %67, %67 : vector<16x32xf32>
    %cst_29 = arith.constant dense<0.000000e+00> : vector<16xf32>
    %71 = vector.multi_reduction <add>, %70, %cst_29 [1] : vector<16x32xf32> to vector<16xf32>
    %72 = vector.shape_cast %71 : vector<16xf32> to vector<16x1xf32>
    %cst_30 = arith.constant 3.200000e+01 : f32
    %73 = vector.broadcast %cst_30 : f32 to vector<16x1xf32>
    %74 = arith.divf %72, %73 : vector<16x1xf32>
    %cst_31 = arith.constant 9.99999997E-7 : f32
    %75 = vector.broadcast %cst_31 : f32 to vector<16x1xf32>
    %76 = arith.addf %74, %75 : vector<16x1xf32>
    %77 = math.rsqrt %76 : vector<16x1xf32>
    %78 = vector.broadcast %77 : vector<16x1xf32> to vector<16x32xf32>
    %79 = arith.mulf %67, %78 : vector<16x32xf32>
    %80 = vector.broadcast %69 : vector<1x32xf32> to vector<16x32xf32>
    %81 = arith.mulf %79, %80 : vector<16x32xf32>
    %82 = arith.truncf %81 : vector<16x32xf32> to vector<16x32xbf16>
    %c0_32 = arith.constant 0 : index
    %c0_33 = arith.constant 0 : index
    %c0_34 = arith.constant 0 : index
    %83 = vector.load %arg8[%c0_32, %c0_33, %c0_34] : memref<2x32x64xbf16, #tpu.memory_space<vmem>>, vector<1x32x64xbf16>
    %84 = vector.shape_cast %83 : vector<1x32x64xbf16> to vector<32x64xbf16>
    %cst_35 = arith.constant dense<0.000000e+00> : vector<16x64xf32>
    %85 = tpu.matmul %82, %84, %cst_35 {dimension_numbers = #tpu.dot_dimension_numbers<[1], [0], [0], [1], [0, 0, 1, 1], [], []>} : vector<16x32xbf16>, vector<32x64xbf16>, vector<16x64xf32> -> vector<16x64xf32>
    %cst_36 = arith.constant 0.000000e+00 : f32
    %86 = vector.broadcast %cst_36 : f32 to vector<16x64xf32>
    %87 = arith.maximumf %85, %86 : vector<16x64xf32>
    %88 = arith.truncf %87 : vector<16x64xf32> to vector<16x64xbf16>
    %c0_37 = arith.constant 0 : index
    %c0_38 = arith.constant 0 : index
    %c0_39 = arith.constant 0 : index
    %89 = vector.load %arg9[%c0_37, %c0_38, %c0_39] : memref<2x64x32xbf16, #tpu.memory_space<vmem>>, vector<1x64x32xbf16>
    %90 = vector.shape_cast %89 : vector<1x64x32xbf16> to vector<64x32xbf16>
    %cst_40 = arith.constant dense<0.000000e+00> : vector<16x32xf32>
    %91 = tpu.matmul %88, %90, %cst_40 {dimension_numbers = #tpu.dot_dimension_numbers<[1], [0], [0], [1], [0, 0, 1, 1], [], []>} : vector<16x64xbf16>, vector<64x32xbf16>, vector<16x32xf32> -> vector<16x32xf32>
    %92 = arith.addf %67, %91 : vector<16x32xf32>
    %c1 = arith.constant 1 : index
    %c0_41 = arith.constant 0 : index
    %c0_42 = arith.constant 0 : index
    %93 = vector.load %arg4[%c1, %c0_41, %c0_42] : memref<2x1x32xf32, #tpu.memory_space<vmem>>, vector<1x1x32xf32>
    %94 = vector.shape_cast %93 : vector<1x1x32xf32> to vector<1x32xf32>
    %95 = arith.mulf %92, %92 : vector<16x32xf32>
    %cst_43 = arith.constant dense<0.000000e+00> : vector<16xf32>
    %96 = vector.multi_reduction <add>, %95, %cst_43 [1] : vector<16x32xf32> to vector<16xf32>
    %97 = vector.shape_cast %96 : vector<16xf32> to vector<16x1xf32>
    %cst_44 = arith.constant 3.200000e+01 : f32
    %98 = vector.broadcast %cst_44 : f32 to vector<16x1xf32>
    %99 = arith.divf %97, %98 : vector<16x1xf32>
    %cst_45 = arith.constant 9.99999997E-7 : f32
    %100 = vector.broadcast %cst_45 : f32 to vector<16x1xf32>
    %101 = arith.addf %99, %100 : vector<16x1xf32>
    %102 = math.rsqrt %101 : vector<16x1xf32>
    %103 = vector.broadcast %102 : vector<16x1xf32> to vector<16x32xf32>
    %104 = arith.mulf %92, %103 : vector<16x32xf32>
    %105 = vector.broadcast %94 : vector<1x32xf32> to vector<16x32xf32>
    %106 = arith.mulf %104, %105 : vector<16x32xf32>
    %107 = arith.truncf %106 : vector<16x32xf32> to vector<16x32xbf16>
    %c1_46 = arith.constant 1 : index
    %c0_47 = arith.constant 0 : index
    %c0_48 = arith.constant 0 : index
    %108 = vector.load %arg5[%c1_46, %c0_47, %c0_48] : memref<2x32x96xbf16, #tpu.memory_space<vmem>>, vector<1x32x96xbf16>
    %109 = vector.shape_cast %108 : vector<1x32x96xbf16> to vector<32x96xbf16>
    %cst_49 = arith.constant dense<0.000000e+00> : vector<16x96xf32>
    %110 = tpu.matmul %107, %109, %cst_49 {dimension_numbers = #tpu.dot_dimension_numbers<[1], [0], [0], [1], [0, 0, 1, 1], [], []>} : vector<16x32xbf16>, vector<32x96xbf16>, vector<16x96xf32> -> vector<16x96xf32>
    %111 = vector.extract_strided_slice %110 {offsets = [0, 0], sizes = [16, 32], strides = [1, 1]} : vector<16x96xf32> to vector<16x32xf32>
    %112 = vector.extract_strided_slice %110 {offsets = [0, 32], sizes = [16, 32], strides = [1, 1]} : vector<16x96xf32> to vector<16x32xf32>
    %113 = vector.extract_strided_slice %110 {offsets = [0, 64], sizes = [16, 32], strides = [1, 1]} : vector<16x96xf32> to vector<16x32xf32>
    %114 = vector.shape_cast %111 : vector<16x32xf32> to vector<2x8x4x8xf32>
    %115 = tpu.transpose %114, [0, 2, 1, 3] : vector<2x8x4x8xf32> -> vector<2x4x8x8xf32>
    %116 = vector.shape_cast %115 : vector<2x4x8x8xf32> to vector<8x8x8xf32>
    %117 = arith.truncf %116 : vector<8x8x8xf32> to vector<8x8x8xbf16>
    %118 = vector.shape_cast %112 : vector<16x32xf32> to vector<2x8x4x8xf32>
    %119 = tpu.transpose %118, [0, 2, 1, 3] : vector<2x8x4x8xf32> -> vector<2x4x8x8xf32>
    %120 = vector.shape_cast %119 : vector<2x4x8x8xf32> to vector<8x8x8xf32>
    %121 = arith.truncf %120 : vector<8x8x8xf32> to vector<8x8x8xbf16>
    %122 = vector.shape_cast %113 : vector<16x32xf32> to vector<2x8x4x8xf32>
    %123 = tpu.transpose %122, [0, 2, 1, 3] : vector<2x8x4x8xf32> -> vector<2x4x8x8xf32>
    %124 = vector.shape_cast %123 : vector<2x4x8x8xf32> to vector<8x8x8xf32>
    %125 = arith.truncf %124 : vector<8x8x8xf32> to vector<8x8x8xbf16>
    "tpu.trace_start"() <{level = 10 : i32, message = "bqd,bkd->bqk"}> : () -> ()
    %cst_50 = arith.constant dense<0.000000e+00> : vector<8x8x8xf32>
    %126 = tpu.matmul %117, %121, %cst_50 {dimension_numbers = #tpu.dot_dimension_numbers<[2], [2], [1], [1], [0, 0, 0, 1, 1, 1], [0], [0]>} : vector<8x8x8xbf16>, vector<8x8x8xbf16>, vector<8x8x8xf32> -> vector<8x8x8xf32>
    "tpu.trace_stop"() : () -> ()
    %127 = arith.addf %126, %12 : vector<8x8x8xf32>
    %cst_51 = arith.constant dense<0xFF800000> : vector<8x8xf32>
    %128 = vector.multi_reduction <maximumf>, %127, %cst_51 [2] : vector<8x8x8xf32> to vector<8x8xf32>
    %129 = vector.shape_cast %128 : vector<8x8xf32> to vector<8x8x1xf32>
    %130 = vector.broadcast %129 : vector<8x8x1xf32> to vector<8x8x8xf32>
    %131 = arith.subf %127, %130 : vector<8x8x8xf32>
    %132 = math.exp %131 : vector<8x8x8xf32>
    %cst_52 = arith.constant dense<0.000000e+00> : vector<8x8xf32>
    %133 = vector.multi_reduction <add>, %132, %cst_52 [2] : vector<8x8x8xf32> to vector<8x8xf32>
    %134 = vector.shape_cast %133 : vector<8x8xf32> to vector<8x8x1xf32>
    %135 = tpu.reciprocal %134 {approx = true} : vector<8x8x1xf32> -> vector<8x8x1xf32>
    %136 = vector.broadcast %135 : vector<8x8x1xf32> to vector<8x8x8xf32>
    %137 = arith.mulf %132, %136 : vector<8x8x8xf32>
    %138 = arith.truncf %137 : vector<8x8x8xf32> to vector<8x8x8xbf16>
    "tpu.trace_start"() <{level = 10 : i32, message = "bqk,bkd->bqd"}> : () -> ()
    %cst_53 = arith.constant dense<0.000000e+00> : vector<8x8x8xf32>
    %139 = tpu.matmul %138, %125, %cst_53 {dimension_numbers = #tpu.dot_dimension_numbers<[2], [1], [1], [2], [0, 0, 0, 1, 1, 2], [0], [0]>} : vector<8x8x8xbf16>, vector<8x8x8xbf16>, vector<8x8x8xf32> -> vector<8x8x8xf32>
    "tpu.trace_stop"() : () -> ()
    %140 = vector.shape_cast %139 : vector<8x8x8xf32> to vector<2x4x8x8xf32>
    %141 = tpu.transpose %140, [0, 2, 1, 3] : vector<2x4x8x8xf32> -> vector<2x8x4x8xf32>
    %142 = vector.shape_cast %141 : vector<2x8x4x8xf32> to vector<16x32xf32>
    %143 = arith.truncf %142 : vector<16x32xf32> to vector<16x32xbf16>
    %c1_54 = arith.constant 1 : index
    %c0_55 = arith.constant 0 : index
    %c0_56 = arith.constant 0 : index
    %144 = vector.load %arg6[%c1_54, %c0_55, %c0_56] : memref<2x32x32xbf16, #tpu.memory_space<vmem>>, vector<1x32x32xbf16>
    %145 = vector.shape_cast %144 : vector<1x32x32xbf16> to vector<32x32xbf16>
    %cst_57 = arith.constant dense<0.000000e+00> : vector<16x32xf32>
    %146 = tpu.matmul %143, %145, %cst_57 {dimension_numbers = #tpu.dot_dimension_numbers<[1], [0], [0], [1], [0, 0, 1, 1], [], []>} : vector<16x32xbf16>, vector<32x32xbf16>, vector<16x32xf32> -> vector<16x32xf32>
    %147 = arith.addf %92, %146 : vector<16x32xf32>
    %c1_58 = arith.constant 1 : index
    %c0_59 = arith.constant 0 : index
    %c0_60 = arith.constant 0 : index
    %148 = vector.load %arg7[%c1_58, %c0_59, %c0_60] : memref<2x1x32xf32, #tpu.memory_space<vmem>>, vector<1x1x32xf32>
    %149 = vector.shape_cast %148 : vector<1x1x32xf32> to vector<1x32xf32>
    %150 = arith.mulf %147, %147 : vector<16x32xf32>
    %cst_61 = arith.constant dense<0.000000e+00> : vector<16xf32>
    %151 = vector.multi_reduction <add>, %150, %cst_61 [1] : vector<16x32xf32> to vector<16xf32>
    %152 = vector.shape_cast %151 : vector<16xf32> to vector<16x1xf32>
    %cst_62 = arith.constant 3.200000e+01 : f32
    %153 = vector.broadcast %cst_62 : f32 to vector<16x1xf32>
    %154 = arith.divf %152, %153 : vector<16x1xf32>
    %cst_63 = arith.constant 9.99999997E-7 : f32
    %155 = vector.broadcast %cst_63 : f32 to vector<16x1xf32>
    %156 = arith.addf %154, %155 : vector<16x1xf32>
    %157 = math.rsqrt %156 : vector<16x1xf32>
    %158 = vector.broadcast %157 : vector<16x1xf32> to vector<16x32xf32>
    %159 = arith.mulf %147, %158 : vector<16x32xf32>
    %160 = vector.broadcast %149 : vector<1x32xf32> to vector<16x32xf32>
    %161 = arith.mulf %159, %160 : vector<16x32xf32>
    %162 = arith.truncf %161 : vector<16x32xf32> to vector<16x32xbf16>
    %c1_64 = arith.constant 1 : index
    %c0_65 = arith.constant 0 : index
    %c0_66 = arith.constant 0 : index
    %163 = vector.load %arg8[%c1_64, %c0_65, %c0_66] : memref<2x32x64xbf16, #tpu.memory_space<vmem>>, vector<1x32x64xbf16>
    %164 = vector.shape_cast %163 : vector<1x32x64xbf16> to vector<32x64xbf16>
    %cst_67 = arith.constant dense<0.000000e+00> : vector<16x64xf32>
    %165 = tpu.matmul %162, %164, %cst_67 {dimension_numbers = #tpu.dot_dimension_numbers<[1], [0], [0], [1], [0, 0, 1, 1], [], []>} : vector<16x32xbf16>, vector<32x64xbf16>, vector<16x64xf32> -> vector<16x64xf32>
    %cst_68 = arith.constant 0.000000e+00 : f32
    %166 = vector.broadcast %cst_68 : f32 to vector<16x64xf32>
    %167 = arith.maximumf %165, %166 : vector<16x64xf32>
    %168 = arith.truncf %167 : vector<16x64xf32> to vector<16x64xbf16>
    %c1_69 = arith.constant 1 : index
    %c0_70 = arith.constant 0 : index
    %c0_71 = arith.constant 0 : index
    %169 = vector.load %arg9[%c1_69, %c0_70, %c0_71] : memref<2x64x32xbf16, #tpu.memory_space<vmem>>, vector<1x64x32xbf16>
    %170 = vector.shape_cast %169 : vector<1x64x32xbf16> to vector<64x32xbf16>
    %cst_72 = arith.constant dense<0.000000e+00> : vector<16x32xf32>
    %171 = tpu.matmul %168, %170, %cst_72 {dimension_numbers = #tpu.dot_dimension_numbers<[1], [0], [0], [1], [0, 0, 1, 1], [], []>} : vector<16x64xbf16>, vector<64x32xbf16>, vector<16x32xf32> -> vector<16x32xf32>
    %172 = arith.addf %147, %171 : vector<16x32xf32>
    %c0_73 = arith.constant 0 : index
    %c0_74 = arith.constant 0 : index
    %173 = vector.load %arg10[%c0_73, %c0_74] : memref<1x32xf32, #tpu.memory_space<vmem>>, vector<1x32xf32>
    %174 = arith.mulf %172, %172 : vector<16x32xf32>
    %cst_75 = arith.constant dense<0.000000e+00> : vector<16xf32>
    %175 = vector.multi_reduction <add>, %174, %cst_75 [1] : vector<16x32xf32> to vector<16xf32>
    %176 = vector.shape_cast %175 : vector<16xf32> to vector<16x1xf32>
    %cst_76 = arith.constant 3.200000e+01 : f32
    %177 = vector.broadcast %cst_76 : f32 to vector<16x1xf32>
    %178 = arith.divf %176, %177 : vector<16x1xf32>
    %cst_77 = arith.constant 9.99999997E-7 : f32
    %179 = vector.broadcast %cst_77 : f32 to vector<16x1xf32>
    %180 = arith.addf %178, %179 : vector<16x1xf32>
    %181 = math.rsqrt %180 : vector<16x1xf32>
    %182 = vector.broadcast %181 : vector<16x1xf32> to vector<16x32xf32>
    %183 = arith.mulf %172, %182 : vector<16x32xf32>
    %184 = vector.broadcast %173 : vector<1x32xf32> to vector<16x32xf32>
    %185 = arith.mulf %183, %184 : vector<16x32xf32>
    %186 = vector.shape_cast %185 : vector<16x32xf32> to vector<2x8x32xf32>
    %c0_78 = arith.constant 0 : index
    %c0_79 = arith.constant 0 : index
    %c0_80 = arith.constant 0 : index
    %187 = vector.load %arg11[%c0_78, %c0_79, %c0_80] : memref<2x8x32xf32, #tpu.memory_space<vmem>>, vector<2x8x32xf32>
    tpu.vector_store %arg11[%c0_78, %c0_79, %c0_80], %186 {strides = array<i32>} : memref<2x8x32xf32, #tpu.memory_space<vmem>>, vector<2x8x32xf32>,
    return
  }
  func.func @transform_0(%arg0: i32) -> (i32, i32) {
    %c0_i32 = arith.constant 0 : i32
    %c0_i32_0 = arith.constant 0 : i32
    return %arg0, %c0_i32 : i32, i32
  }
  func.func @transform_1(%arg0: i32) -> (i32, i32, i32) {
    %c0_i32 = arith.constant 0 : i32
    %c0_i32_0 = arith.constant 0 : i32
    %c0_i32_1 = arith.constant 0 : i32
    return %arg0, %c0_i32, %c0_i32_0 : i32, i32, i32
  }
  func.func @transform_2(%arg0: i32) -> (i32, i32, i32) {
    %c0_i32 = arith.constant 0 : i32
    %c0_i32_0 = arith.constant 0 : i32
    %c0_i32_1 = arith.constant 0 : i32
    %c0_i32_2 = arith.constant 0 : i32
    return %c0_i32, %c0_i32_0, %c0_i32_1 : i32, i32, i32
  }
  func.func @transform_3(%arg0: i32) -> (i32, i32, i32) {
    %c0_i32 = arith.constant 0 : i32
    %c0_i32_0 = arith.constant 0 : i32
    %c0_i32_1 = arith.constant 0 : i32
    %c0_i32_2 = arith.constant 0 : i32
    return %c0_i32, %c0_i32_0, %c0_i32_1 : i32, i32, i32
  }
  func.func @transform_4(%arg0: i32) -> (i32, i32, i32) {
    %c0_i32 = arith.constant 0 : i32
    %c0_i32_0 = arith.constant 0 : i32
    %c0_i32_1 = arith.constant 0 : i32
    %c0_i32_2 = arith.constant 0 : i32
    return %c0_i32, %c0_i32_0, %c0_i32_1 : i32, i32, i32
  }
  func.func @transform_5(%arg0: i32) -> (i32, i32, i32) {
    %c0_i32 = arith.constant 0 : i32
    %c0_i32_0 = arith.constant 0 : i32
    %c0_i32_1 = arith.constant 0 : i32
    %c0_i32_2 = arith.constant 0 : i32
    return %c0_i32, %c0_i32_0, %c0_i32_1 : i32, i32, i32
  }
  func.func @transform_6(%arg0: i32) -> (i32, i32, i32) {
    %c0_i32 = arith.constant 0 : i32
    %c0_i32_0 = arith.constant 0 : i32
    %c0_i32_1 = arith.constant 0 : i32
    %c0_i32_2 = arith.constant 0 : i32
    return %c0_i32, %c0_i32_0, %c0_i32_1 : i32, i32, i32
  }
  func.func @transform_7(%arg0: i32) -> (i32, i32, i32) {
    %c0_i32 = arith.constant 0 : i32
    %c0_i32_0 = arith.constant 0 : i32
    %c0_i32_1 = arith.constant 0 : i32
    %c0_i32_2 = arith.constant 0 : i32
    return %c0_i32, %c0_i32_0, %c0_i32_1 : i32, i32, i32
  }
  func.func @transform_8(%arg0: i32) -> (i32, i32, i32) {
    %c0_i32 = arith.constant 0 : i32
    %c0_i32_0 = arith.constant 0 : i32
    %c0_i32_1 = arith.constant 0 : i32
    %c0_i32_2 = arith.constant 0 : i32
    return %c0_i32, %c0_i32_0, %c0_i32_1 : i32, i32, i32
  }
  func.func @transform_9(%arg0: i32) -> (i32, i32) {
    %c0_i32 = arith.constant 0 : i32
    %c0_i32_0 = arith.constant 0 : i32
    %c0_i32_1 = arith.constant 0 : i32
    return %c0_i32, %c0_i32_0 : i32, i32
  }
  func.func @transform_10(%arg0: i32) -> (i32, i32, i32) {
    %c0_i32 = arith.constant 0 : i32
    %c0_i32_0 = arith.constant 0 : i32
    %c0_i32_1 = arith.constant 0 : i32
    return %arg0, %c0_i32, %c0_i32_0 : i32, i32, i32
  }
}

</mosaic_0001>

<bundles_post_ra>
// kernel: encoder_wrapper_forward.1
= control target key start
LH: loop header
LB: loop body
LE: loop exit
PB: predicated region body
PF: predicated region fallthrough
CT: control target
= control target key end

     0   :  { %15 = vsyncpa [#allocation3], 0  ;;  %s7169_s0 = inlined_call_operand.vmem [shape: f32[32,32], index: 0, kind: input, shape index: {}]   ;;  %s7170_s1 = inlined_call_operand.vmem [shape: f32[4,1,8], index: 1, kind: input, shape index: {}]   ;;  %s7171_s2 = inlined_call_operand.vmem [shape: f32[4,8,8], index: 2, kind: input, shape index: {}]   ;;  %s7172_s3 = inlined_call_operand.vmem [shape: f32[2,1,32], index: 3, kind: input, shape index: {}]   ;;  %s7173_s4 = inlined_call_operand.vmem [shape: bf16[2,32,96], index: 4, kind: input, shape index: {}]   ;;  %s7174_s5 = inlined_call_operand.vmem [shape: bf16[2,32,32], index: 5, kind: input, shape index: {}]   ;;  %s7175_s6 = inlined_call_operand.vmem [shape: f32[2,1,32], index: 6, kind: input, shape index: {}]   ;;  %s7176_s7 = inlined_call_operand.vmem [shape: bf16[2,32,64], index: 7, kind: input, shape index: {}]   ;;  %s7177_s8 = inlined_call_operand.vmem [shape: bf16[2,64,32], index: 8, kind: input, shape index: {}]   ;;  %s7178_s9 = inlined_call_operand.vmem [shape: f32[1,32], index: 9, kind: input, shape index: {}]   ;;  %s7179_s10 = inlined_call_operand.hbm [shape: f32[4,8,32], index: 10, kind: output, shape index: {}]  }
   0x1   :  { %17 = vsyncpa [#allocation3 + $0x1], 0  ;;  %s6064_s13 = smov 0   ;;  %s6066_s14 = smov 0  }
   0x2   :  { %s6068_s15 = smov 0   ;;  %s6070_s16 = smov 0  }
   0x3 LB: > { %s6085_s17 = sadd.s32 4294967295, %s5993_s16   ;;  %s5254_s18 = sadd.s32 4294967294, %s5993_s16   ;;  %s5993_s16 = sphi %s6070_s16, %s7199_s16   ;;  %s5989_s15 = sphi %s6068_s15, %s7198_s15   ;;  %s5985_s14 = sphi %s6066_s14, %s7197_s14   ;;  %s5981_s13 = sphi %s6064_s13, %s7196_s13  }
   0x4   : > { %s6089_s19 = sadd.s32 1, %s5993_s16   ;;  %s250_s20 = sadd.s32 1, %s5989_s15 }
   0x5   : > { %s247_s21 = ssub.s32 %s5993_s16, %s6089_s19  ;;  %p260_p0 = scmp.ne.s32.totalorder %s5989_s15, %s5985_s14 }
   0x6   : > { %p248_p1 = scmp.eq.s32.totalorder %s247_s21, 0  ;;  %p261_p2 = scmp.eq.s32.totalorder %s6085_s17, 1 }
   0x7   : > { %p266_p3 = scmp.ne.s32.totalorder %s5985_s14, %s5981_s13  ;;  %p267_p4 = scmp.eq.s32.totalorder %s5254_s18, 1 }
   0x8   : > { %s6100_s22 = scalar_select %p248_p1, %s5989_s15, %s250_s20  }
   0x9   : > { %p6102_p5 = por %p261_p2, %p260_p0  ;;  %p6106_p6 = por %p267_p4, %p266_p3 }
   0xa   : > { %p5257_p7 = scmp.ge.s32.totalorder %s5993_s16, 1  ;;  %p326_p8 = scmp.lt.s32.totalorder %s5993_s16, 3 }
   0xc   : > { %p327_p9 = pnand %p5257_p7, %p326_p8 }
   0xd   : > { %s5259_s25 = sshll.u32 (!%p327_p9), %s6085_s17, 1  ;;  %vm416_vm0 = vcmask (!%p327_p9), 261120   ;;  %v5825_v6 = vld [vmem:[%s7173_s4] sm:$0xff] (!%p327_p9)   ;;  %v5995_v7 = vmov (!%p327_p9), 0.0   ;;  %vm5996_vm1 = vmmov (!%p327_p9), 0   ;;  %v5826_v8 = vld [vmem:[%s7173_s4 + $0x8] sm:$0xff] (!%p327_p9)   ;;  %v395_v27 = vlaneseq (!%p327_p9) }
   0xe   : > { %330 = sbr.rel (%p327_p9) target bundleno = 5038 (0x13ae), region = 60  ;;  %p369_p10 = scmp.lt.s32.totalorder (!%p327_p9), %s5259_s25, 3  ;;  %5479 = vmatprep.subr.bf16.mxu1 (!%p327_p9), %v5995_v7  ;;  %5483 = vmatprep.mubr.msk.bf16.mxu1 (!%p327_p9), %vm5996_vm1, %v5995_v7  ;;  %v5262_v18 = vld [vmem:[%s7172_s3] ss:$0 sm:$0xff] (!%p327_p9)  ;;  %v6001_v28 = vmov (!%p327_p9), 1983009808  }
   0xf   : > { %5480 = vmatpush3.bf16.msra.mxu1 (!%p327_p9), %v5825_v6  ;;  %5493 = vmatprep.subr.bf16.mxu0 (!%p327_p9), %v5995_v7  ;;  %s7184_s27 = smov (!%p327_p9), 120   ;;  %s5999_s28 = smov (!%p327_p9), 112   ;;  %v524_v29 = vunpack.c.l.s4 (!%p327_p9), %v6001_v28  ;;  %v6002_v30 = vmov (!%p327_p9), 1934713408   ;;  %v6163_v32 = vshrl.u32 (!%p327_p9), %v395_v27, 7  ;;  %vm1409_vm2 = vcmask (!%p327_p9), 64512  }
  0x10   : > { %5481 = vmatprep.subr.bf16.mxu1 (!%p327_p9), %v5995_v7  ;;  %5495 = vmatprep.mubr.msk.bf16.mxu0 (!%p327_p9), %vm5996_vm1, %v5995_v7  ;;  %s7180_s30 = smov (!%p327_p9), 96   ;;  %v556_v31 = vunpack.c.l.s4 (!%p327_p9), %v6002_v30  ;;  %s6003_s11 = smov (!%p327_p9), 64   ;;  %vm1877_vm3 = vcmask (!%p327_p9), 1043456   ;;  %vm2541_vm4 = vcmask (!%p327_p9), 130048   ;;  %vm2544_vm5 = vcmask (!%p327_p9), 195584  }
  0x11   : > { %v525_v33 = vunpack.c.0.s8 (!%p327_p9), %v524_v29  ;;  %vm2731_vm6 = vcmask (!%p327_p9), 523264   ;;  %s7191_s18 = smov (!%p327_p9), 120   ;;  %s7194_s12 = smov (!%p327_p9), 8  }
  0x12   : > { %v557_v36 = vunpack.c.0.s8 (!%p327_p9), %v556_v31 }
  0x13   : > { %5482 = vmatpush3.bf16.msra.mxu1 (!%p327_p9), %v5826_v8  ;;  %v6168_v37 = vsub.s32 (!%p327_p9), %v525_v33, %v6163_v32 }
  0x14   : > { %5487 = vmatprep.subr.bf16.mxu1 (!%p327_p9), %v5995_v7  ;;  %v6174_v43 = vsub.s32 (!%p327_p9), %v557_v36, %v6163_v32 }
  0x15   : > { %s7201_s25 = smov (!%p369_p10, %s5259_s25), 3 }
  0x16   : > { %s5260_s26 = sshll.u32 %s7201_s25, 3  ;;  %s377_s20 = scalar_lea.vmem %s7170_s1, %s7201_s25 }
  0x17   : > { %s6119_s29 = scalar_lea.vmem %s7169_s0, %s5260_s26  ;;  %s7182_s26 = smov 104  }
  0x18   : > { %v381_v0 = vld [vmem:[%s6119_s29] sm:$0xff]  ;;  %v382_v1 = vld [vmem:[%s6119_s29 + $0x8] sm:$0xff]  ;;  %s6004_s25 = smov 16  }
  0x19   : > { %v414_v2 = vmul.f32 %v381_v0, %v381_v0  ;;  %v415_v3 = vmul.f32 %v382_v1, %v382_v1 }
  0x1b   : > { %v417_v4 = vsel %vm416_vm0, %v414_v2, 0.0  ;;  %v420_v5 = vsel %vm416_vm0, %v415_v3, 0.0 }
  0x1c   : > { %418 = vadd.xlane.f32.xlu0 %v417_v4 }
  0x20   : > { %421 = vadd.xlane.f32.xlu0 %v420_v5 }
  0xa9   : > { %v419_v9 = vpop.xlane.xlu0 %418 }
  0xaa   : > { %v424_v10 = vmul.f32 0.03125, %v419_v9 }
  0xac   : > { %v426_v11 = vadd.f32 1e-06, %v424_v10 }
  0xad   : > { %v422_v12 = vpop.xlane.xlu0 %421 }
  0xae   : > { %5845 = vrsqrt.f32 %v426_v11  ;;  %v425_v13 = vmul.f32 0.03125, %v422_v12 }
  0xb0   : > { %v427_v14 = vadd.f32 1e-06, %v425_v13 }
  0xb2   : > { %5847 = vrsqrt.f32 %v427_v14 }
  0xb8   : > { %v5846_v15 = vpop.eup %5845 }
  0xb9   : > { %v430_v16 = vmul.f32 %v5846_v15, %v381_v0 }
  0xbb   : > { %v438_v20 = vmul.f32 %v5262_v18, %v430_v16 }
  0xbc   : > { %v5848_v17 = vpop.eup %5847 }
  0xbd   : > { %v431_v19 = vmul.f32 %v5848_v17, %v382_v1 }
  0xbf   : > { %v439_v21 = vmul.f32 %v5262_v18, %v431_v19 }
  0xc1   : > { %v440_v22 = vpack.c.bf16 %v439_v21, %v438_v20 }
  0xc3   : > { %5484 = vmatmul.mubr.msk.bf16.vlgmr.msra.gmra.mrb[0].mxu1 %vm416_vm0, %v440_v22 }
  0xc4   : > { %5489 = vmatprep.mubr.msk.bf16.mxu1 %vm5996_vm1, %v5995_v7 }
 0x196   : > { %v6145_v23 = vpop.f32.mrb[0].mxu1 }
 0x197   : > { %515 = vrot.lane.b32.xlu0 %v6145_v23, %s7182_s26  ;;  %503 = vrot.lane.b32.xlu1 %v6145_v23, %s7184_s27  ;;  %v5485_v24 = vpop.f32.mrb[1].mxu1 }
 0x198   : > { %v6151_v25 = vpop.f32.mrb[2].mxu1 }
 0x199   : > { %v5486_v26 = vpop.f32.mrb[3].mxu1 }
 0x19b   : > { %509 = vrot.lane.b32.xlu1 %v6145_v23, %s5999_s28 }
 0x19f   : > { %505 = vrot.lane.b32.xlu1 %v6151_v25, %s7184_s27  ;;  %s7186_s27 = smov 24  }
 0x1a3   : > { %511 = vrot.lane.b32.xlu1 %v6151_v25, %s5999_s28 }
 0x1a7   : > { %517 = vrot.lane.b32.xlu1 %v6151_v25, %s7182_s26  ;;  %s7187_s26 = smov 8  }
 0x1ab   : > { %801 = vrot.lane.b32.xlu1 %v6145_v23, %s7180_s30 }
 0x209   : > { %v516_v34 = vpop.permute.xlu0 %515  ;;  %v504_v35 = vpop.permute.xlu1 %503 }
 0x20a   : > { %813 = vrot.lane.b32.xlu0 %v516_v34, %s7180_s30  ;;  %805 = vrot.lane.b32.xlu1 %v504_v35, %s7180_s30  ;;  %v537_v38 = vcombine.low %v504_v35, %v516_v34  ;;  %v538_v39 = vcombine.high %v504_v35, %v516_v34 }
 0x20c   : > { %v545_v44 = vrot.slane %v537_v38, %v6168_v37  ;;  %v552_v45 = vrot.slane %v538_v39, %v6168_v37 }
 0x20d   : > { %v510_v40 = vpop.permute.xlu1 %509 }
 0x20e   : > { %v521_v41 = vcombine.low %v6145_v23, %v510_v40  ;;  %v522_v42 = vcombine.high %v6145_v23, %v510_v40  ;;  %809 = vrot.lane.b32.xlu1 %v510_v40, %s7180_s30 }
 0x210   : > { %v529_v46 = vrot.slane %v521_v41, %v6168_v37  ;;  %v536_v47 = vrot.slane %v522_v42, %v6168_v37 }
 0x211   : > { %v6180_v48 = vpop.permute.xlu1 %505 }
 0x212   : > { %v553_v49 = vcombine.low %v529_v46, %v545_v44  ;;  %v554_v50 = vcombine.high %v529_v46, %v545_v44  ;;  %v569_v51 = vcombine.low %v536_v47, %v552_v45  ;;  %v570_v52 = vcombine.high %v536_v47, %v552_v45  ;;  %803 = vrot.lane.b32.xlu1 %v6151_v25, %s7180_s30 }
 0x213   : > { %807 = vrot.lane.b32.xlu0 %v6180_v48, %s7180_s30 }
 0x214   : > { %v561_v53 = vrot.slane %v553_v49, %v6174_v43  ;;  %v568_v54 = vrot.slane %v554_v50, %v6174_v43  ;;  %v577_v55 = vrot.slane %v569_v51, %v6174_v43  ;;  %v584_v56 = vrot.slane %v570_v52, %v6174_v43 }
 0x215   : > { %v6190_v57 = vpop.permute.xlu1 %511 }
 0x216   : > { %v657_v58 = vcombine.low %v561_v53, %v568_v54  ;;  %v5266_v59 = vcombine.high %v561_v53, %v568_v54  ;;  %v673_v60 = vcombine.low %v577_v55, %v584_v56  ;;  %v5267_v61 = vcombine.high %v577_v55, %v584_v56  ;;  %811 = vrot.lane.b32.xlu1 %v6190_v57, %s7180_s30 }
 0x217   : > { %v589_v18 = vcombine.low %v6151_v25, %v6190_v57 }
 0x218   : > { %v664_v62 = vrot.slane %v657_v58, %v6168_v37  ;;  %v672_v63 = vrot.slane %v5266_v59, %v6168_v37  ;;  %v680_v0 = vrot.slane %v673_v60, %v6168_v37  ;;  %v688_v1 = vrot.slane %v5267_v61, %v6168_v37 }
 0x219   : > { %v6198_v2 = vpop.permute.xlu1 %517  ;;  %v597_v24 = vrot.slane %v589_v18, %v6168_v37 }
 0x21a   : > { %1109 = vrot.lane.b32.xlu1 %v504_v35, %s6003_s11  ;;  %815 = vrot.lane.b32.xlu0 %v6198_v2, %s7180_s30  ;;  %v689_v3 = vcombine.low %v664_v62, %v672_v63  ;;  %v705_v4 = vcombine.low %v680_v0, %v688_v1  ;;  %v690_v5 = vcombine.high %v664_v62, %v672_v63  ;;  %s5386_s30 = sshll.u32 %s6085_s17, 8 }
 0x21b   : > { %v706_v6 = vcombine.high %v680_v0, %v688_v1  ;;  %v605_v16 = vcombine.low %v6180_v48, %v6198_v2  ;;  %v606_v19 = vcombine.high %v6180_v48, %v6198_v2 }
 0x21c   : > { %v697_v8 = vrot.slane %v689_v3, %v6174_v43  ;;  %v713_v9 = vrot.slane %v705_v4, %v6174_v43  ;;  %v704_v10 = vrot.slane %v690_v5, %v6174_v43 }
 0x21d   : > { %v720_v11 = vrot.slane %v706_v6, %v6174_v43  ;;  %v802_v17 = vpop.permute.xlu1 %801  ;;  %v613_v20 = vrot.slane %v605_v16, %v6168_v37  ;;  %v620_v28 = vrot.slane %v606_v19, %v6168_v37 }
 0x21e   : > { %1113 = vrot.lane.b32.xlu1 %v510_v40, %s6003_s11  ;;  %1105 = vrot.lane.b32.xlu0 %v6145_v23, %s6003_s11  ;;  %v6210_v12 = vcombine.low %v697_v8, %v713_v9  ;;  %v6212_v13 = vcombine.high %v697_v8, %v713_v9  ;;  %v590_v23 = vcombine.high %v6151_v25, %v6190_v57 }
 0x21f   : > { %v6214_v14 = vcombine.low %v704_v10, %v720_v11  ;;  %v6216_v15 = vcombine.high %v704_v10, %v720_v11  ;;  %v621_v29 = vcombine.low %v597_v24, %v613_v20  ;;  %v622_v30 = vcombine.high %v597_v24, %v613_v20 }
 0x220   : > { %v604_v35 = vrot.slane %v590_v23, %v6168_v37  ;;  %v793_v5 = vpack.c.bf16 %v6210_v12, %v6210_v12 }
 0x221   : > { %v629_v41 = vrot.slane %v621_v29, %v6174_v43  ;;  %v636_v42 = vrot.slane %v622_v30, %v6174_v43 }
 0x222   : > { %1117 = vrot.lane.b32.xlu0 %v516_v34, %s6003_s11  ;;  %v637_v44 = vcombine.low %v604_v35, %v620_v28  ;;  %v638_v45 = vcombine.high %v604_v35, %v620_v28 }
 0x223   : > { %v725_v59 = vcombine.low %v629_v41, %v636_v42  ;;  %v5268_v16 = vcombine.high %v629_v41, %v636_v42 }
 0x224   : > { %v6242_v56 = vrot.slane %v637_v44, %v6174_v43  ;;  %v6245_v58 = vrot.slane %v638_v45, %v6174_v43 }
 0x225   : > { %v6254_v11 = vrot.slane %v725_v59, %v6168_v37  ;;  %v6267_v35 = vrot.slane %v5268_v16, %v6168_v37 }
 0x226   : > { %v5269_v18 = vcombine.high %v6242_v56, %v6245_v58 }
 0x27c   : > { %v814_v21 = vpop.permute.xlu0 %813  ;;  %v806_v22 = vpop.permute.xlu1 %805 }
 0x27d   : > { %v841_v26 = vcombine.low %v806_v22, %v814_v21  ;;  %v842_v27 = vcombine.high %v806_v22, %v814_v21 }
 0x27f   : > { %v849_v36 = vrot.slane %v841_v26, %v6168_v37  ;;  %v856_v38 = vrot.slane %v842_v27, %v6168_v37 }
 0x280   : > { %v810_v31 = vpop.permute.xlu1 %809 }
 0x281   : > { %v825_v33 = vcombine.low %v802_v17, %v810_v31  ;;  %v826_v34 = vcombine.high %v802_v17, %v810_v31  ;;  %v741_v17 = vcombine.low %v6242_v56, %v6245_v58 }
 0x283   : > { %v833_v39 = vrot.slane %v825_v33, %v6168_v37  ;;  %v840_v40 = vrot.slane %v826_v34, %v6168_v37 }
 0x284   : > { %v804_v46 = vpop.permute.xlu1 %803 }
 0x285   : > { %v857_v47 = vcombine.low %v833_v39, %v849_v36  ;;  %v858_v49 = vcombine.high %v833_v39, %v849_v36  ;;  %v873_v50 = vcombine.low %v840_v40, %v856_v38  ;;  %v874_v51 = vcombine.high %v840_v40, %v856_v38  ;;  %v808_v60 = vpop.permute.xlu0 %807 }
 0x286   : > { %v6270_v36 = vrot.slane %v741_v17, %v6168_v37 }
 0x287   : > { %v865_v52 = vrot.slane %v857_v47, %v6174_v43  ;;  %v872_v53 = vrot.slane %v858_v49, %v6174_v43  ;;  %v881_v54 = vrot.slane %v873_v50, %v6174_v43  ;;  %v888_v55 = vrot.slane %v874_v51, %v6174_v43 }
 0x288   : > { %v812_v61 = vpop.permute.xlu1 %811 }
 0x289   : > { %v961_v62 = vcombine.low %v865_v52, %v872_v53  ;;  %v5270_v63 = vcombine.high %v865_v52, %v872_v53  ;;  %v977_v0 = vcombine.low %v881_v54, %v888_v55  ;;  %v5271_v1 = vcombine.high %v881_v54, %v888_v55 }
 0x28a   : > { %v893_v3 = vcombine.low %v804_v46, %v812_v61  ;;  %v894_v4 = vcombine.high %v804_v46, %v812_v61 }
 0x28b   : > { %v968_v6 = vrot.slane %v961_v62, %v6168_v37  ;;  %v976_v8 = vrot.slane %v5270_v63, %v6168_v37  ;;  %v984_v9 = vrot.slane %v977_v0, %v6168_v37  ;;  %v992_v10 = vrot.slane %v5271_v1, %v6168_v37 }
 0x28c   : > { %v816_v19 = vpop.permute.xlu0 %815  ;;  %v1110_v20 = vpop.permute.xlu1 %1109  ;;  %v901_v26 = vrot.slane %v893_v3, %v6168_v37  ;;  %v908_v27 = vrot.slane %v894_v4, %v6168_v37 }
 0x28d   : > { %v909_v21 = vcombine.low %v808_v60, %v816_v19  ;;  %v910_v22 = vcombine.high %v808_v60, %v816_v19  ;;  %v993_v23 = vcombine.low %v968_v6, %v976_v8  ;;  %v1009_v24 = vcombine.low %v984_v9, %v992_v10 }
 0x28e   : > { %v994_v28 = vcombine.high %v968_v6, %v976_v8  ;;  %v1010_v29 = vcombine.high %v984_v9, %v992_v10 }
 0x28f   : > { %v917_v30 = vrot.slane %v909_v21, %v6168_v37  ;;  %v924_v31 = vrot.slane %v910_v22, %v6168_v37  ;;  %v1001_v33 = vrot.slane %v993_v23, %v6174_v43  ;;  %v1017_v34 = vrot.slane %v1009_v24, %v6174_v43 }
 0x290   : > { %v1114_v38 = vpop.permute.xlu1 %1113  ;;  %v1008_v39 = vrot.slane %v994_v28, %v6174_v43  ;;  %v1024_v40 = vrot.slane %v1010_v29, %v6174_v43  ;;  %v1106_v46 = vpop.permute.xlu0 %1105  ;;  %v6290_v22 = vrot.slane %v5269_v18, %v6168_v37 }
 0x291   : > { %v925_v41 = vcombine.low %v901_v26, %v917_v30  ;;  %v926_v42 = vcombine.high %v901_v26, %v917_v30  ;;  %v941_v44 = vcombine.low %v908_v27, %v924_v31  ;;  %v942_v45 = vcombine.high %v908_v27, %v924_v31 }
 0x292   : > { %v1129_v47 = vcombine.low %v1106_v46, %v1114_v38  ;;  %v1130_v49 = vcombine.high %v1106_v46, %v1114_v38  ;;  %v1025_v50 = vcombine.low %v1001_v33, %v1017_v34  ;;  %v1026_v51 = vcombine.high %v1001_v33, %v1017_v34 }
 0x293   : > { %v933_v52 = vrot.slane %v925_v41, %v6174_v43  ;;  %v940_v53 = vrot.slane %v926_v42, %v6174_v43  ;;  %v949_v54 = vrot.slane %v941_v44, %v6174_v43  ;;  %v956_v55 = vrot.slane %v942_v45, %v6174_v43 }
 0x294   : > { %v1137_v56 = vrot.slane %v1129_v47, %v6168_v37  ;;  %v1144_v58 = vrot.slane %v1130_v49, %v6168_v37  ;;  %v1097_v59 = vpack.c.bf16 %v1025_v50, %v1025_v50  ;;  %v1098_v60 = vpack.c.bf16 %v1026_v51, %v1026_v51  ;;  %v1118_v1 = vpop.permute.xlu0 %1117 }
 0x295   : > { %v1029_v61 = vcombine.low %v933_v52, %v940_v53  ;;  %v5272_v62 = vcombine.high %v933_v52, %v940_v53  ;;  %v1045_v63 = vcombine.low %v949_v54, %v956_v55  ;;  %v5273_v0 = vcombine.high %v949_v54, %v956_v55 }
 0x296   : > { %v1145_v3 = vcombine.low %v1110_v20, %v1118_v1  ;;  %v1146_v4 = vcombine.high %v1110_v20, %v1118_v1  ;;  %v1414_v6 = vsel %vm1409_vm2, %v1097_v59, 0  ;;  %v1460_v8 = vsel %vm1409_vm2, %v1098_v60, 0 }
 0x297   : > { %v1036_v9 = vrot.slane %v1029_v61, %v6168_v37  ;;  %v1044_v10 = vrot.slane %v5272_v62, %v6168_v37  ;;  %v1052_v16 = vrot.slane %v1045_v63, %v6168_v37  ;;  %v1060_v17 = vrot.slane %v5273_v0, %v6168_v37  ;;  %5488 = vmatpush3.bf16.xpose.msra.mxu1 %v1414_v6 }
 0x298   : > { %v1153_v19 = vrot.slane %v1145_v3, %v6168_v37  ;;  %v1160_v21 = vrot.slane %v1146_v4, %v6168_v37  ;;  %5494 = vmatpush3.bf16.xpose.msra.mxu0 %v1460_v8  ;;  %5499 = vmatprep.subr.bf16.mxu1 %v5995_v7  ;;  %v1027_v20 = vcombine.low %v1008_v39, %v1024_v40 }
 0x299   : > { %5505 = vmatprep.subr.bf16.mxu0 %v5995_v7  ;;  %v1028_v23 = vcombine.high %v1008_v39, %v1024_v40  ;;  %v1061_v24 = vcombine.low %v1036_v9, %v1044_v10  ;;  %v1077_v26 = vcombine.low %v1052_v16, %v1060_v17  ;;  %v794_v40 = vpack.c.bf16 %v6212_v13, %v6212_v13 }
 0x29a   : > { %v1161_v27 = vcombine.low %v1137_v56, %v1153_v19  ;;  %v1162_v28 = vcombine.high %v1137_v56, %v1153_v19  ;;  %v1177_v29 = vcombine.low %v1144_v58, %v1160_v21  ;;  %v1178_v30 = vcombine.high %v1144_v58, %v1160_v21 }
 0x29b   : > { %v1099_v31 = vpack.c.bf16 %v1027_v20, %v1027_v20  ;;  %v1100_v33 = vpack.c.bf16 %v1028_v23, %v1028_v23  ;;  %v1069_v34 = vrot.slane %v1061_v24, %v6174_v43  ;;  %v1085_v38 = vrot.slane %v1077_v26, %v6174_v43 }
 0x29c   : > { %v1169_v41 = vrot.slane %v1161_v27, %v6174_v43  ;;  %v1176_v18 = vrot.slane %v1162_v28, %v6174_v43  ;;  %v1185_v42 = vrot.slane %v1177_v29, %v6174_v43  ;;  %v1192_v39 = vrot.slane %v1178_v30, %v6174_v43 }
 0x29d   : > { %v1506_v44 = vsel %vm1409_vm2, %v1099_v31, 0  ;;  %v1093_v45 = vcombine.low %v1069_v34, %v1085_v38  ;;  %v1062_v46 = vcombine.high %v1036_v9, %v1044_v10  ;;  %v1552_v52 = vsel %vm1409_vm2, %v1100_v33, 0 }
 0x29e   : > { %v1265_v47 = vcombine.low %v1169_v41, %v1176_v18  ;;  %v5274_v49 = vcombine.high %v1169_v41, %v1176_v18  ;;  %v1281_v50 = vcombine.low %v1185_v42, %v1192_v39  ;;  %v5275_v51 = vcombine.high %v1185_v42, %v1192_v39  ;;  %5490 = vmatmul.mubr.msk.bf16.vlgmr.msra.gmra.mrb[4].mxu1 %vm1409_vm2, %v793_v5 }
 0x29f   : > { %5496 = vmatmul.mubr.msk.bf16.vlgmr.msra.gmra.mrb[0].mxu0 %vm1409_vm2, %v794_v40  ;;  %5500 = vmatpush3.bf16.xpose.msra.mxu1 %v1506_v44  ;;  %v1094_v53 = vcombine.high %v1069_v34, %v1085_v38  ;;  %v757_v13 = vcombine.low %v6254_v11, %v6267_v35  ;;  %v773_v54 = vcombine.low %v6270_v36, %v6290_v22 }
 0x2a0   : > { %v1272_v55 = vrot.slane %v1265_v47, %v6168_v37  ;;  %v1280_v56 = vrot.slane %v5274_v49, %v6168_v37  ;;  %v1288_v12 = vrot.slane %v1281_v50, %v6168_v37  ;;  %v1296_v5 = vrot.slane %v5275_v51, %v6168_v37  ;;  %5506 = vmatpush3.bf16.xpose.msra.mxu0 %v1552_v52  ;;  %v383_v49 = vld [vmem:[%s377_s20] sm:$0x1] }
 0x2a1   : > { %5501 = vmatprep.mubr.msk.bf16.mxu1 %vm5996_vm1, %v5995_v7  ;;  %5507 = vmatprep.mubr.msk.bf16.mxu0 %vm5996_vm1, %v5995_v7  ;;  %v1078_v58 = vcombine.high %v1052_v16, %v1060_v17  ;;  %v1101_v59 = vpack.c.bf16 %v1093_v45, %v1093_v45  ;;  %v1076_v60 = vrot.slane %v1062_v46, %v6174_v43  ;;  %v385_v50 = vsub.f32 1.0, %v383_v49 }
 0x2a2   : > { %5511 = vmatprep.subr.bf16.mxu1 %v5995_v7  ;;  %5517 = vmatprep.subr.bf16.mxu0 %v5995_v7  ;;  %v1298_v61 = vcombine.high %v1272_v55, %v1280_v56  ;;  %v1102_v62 = vpack.c.bf16 %v1094_v53, %v1094_v53  ;;  %v1314_v0 = vcombine.high %v1288_v12, %v1296_v5  ;;  %v397_v52 = vsub.s32 0, %v6163_v32 }
 0x2a3   : > { %v1092_v63 = vrot.slane %v1078_v58, %v6174_v43  ;;  %v795_v1 = vpack.c.bf16 %v6214_v14, %v6214_v14  ;;  %v765_v3 = vrot.slane %v757_v13, %v6174_v43  ;;  %v781_v4 = vrot.slane %v773_v54, %v6174_v43  ;;  %v389_v13 = vld [vmem:[%s7171_s2] sm:$0xff]  ;;  %v390_v54 = vld [vmem:[%s7171_s2 + $0x8] sm:$0xff] }
 0x2a4   : > { %v1312_v6 = vrot.slane %v1298_v61, %v6174_v43  ;;  %v796_v8 = vpack.c.bf16 %v6216_v15, %v6216_v15  ;;  %v1328_v9 = vrot.slane %v1314_v0, %v6174_v43  ;;  %v1598_v10 = vsel %vm1409_vm2, %v1101_v59, 0  ;;  %v391_v0 = vld [vmem:[%s7171_s2 + $0x10] sm:$0xff] }
 0x2a5   : > { %v1095_v16 = vcombine.low %v1076_v60, %v1092_v63  ;;  %v1297_v17 = vcombine.low %v1272_v55, %v1280_v56  ;;  %v1313_v19 = vcombine.low %v1288_v12, %v1296_v5  ;;  %v1644_v14 = vsel %vm1409_vm2, %v1102_v62, 0  ;;  %v384_v56 = vld [vmem:[%s377_s20 + $0x1] sm:$0x1]  ;;  %s7192_s20 = smov 104  }
 0x2a6   : > { %5502 = vmatmul.mubr.msk.bf16.vlgmr.msra.gmra.mrb[8].mxu1 %vm1409_vm2, %v795_v1  ;;  %v1096_v21 = vcombine.high %v1076_v60, %v1092_v63  ;;  %v758_v20 = vcombine.high %v6254_v11, %v6267_v35  ;;  %v6338_v23 = vcombine.high %v1312_v6, %v1328_v9  ;;  %v789_v15 = vcombine.low %v765_v3, %v781_v4 }
 0x2a7   : > { %5508 = vmatmul.mubr.msk.bf16.vlgmr.msra.gmra.mrb[4].mxu0 %vm1409_vm2, %v796_v8  ;;  %5512 = vmatpush3.bf16.xpose.msra.mxu1 %v1598_v10  ;;  %v774_v24 = vcombine.high %v6270_v36, %v6290_v22  ;;  %v6344_v26 = vcombine.low %v1312_v6, %v1328_v9  ;;  %v790_v27 = vcombine.high %v765_v3, %v781_v4  ;;  %v387_v51 = vmul.f32 -1e+09, %v385_v50  ;;  %v392_v6 = vld [vmem:[%s7171_s2 + $0x18] sm:$0xff] }
 0x2a8   : > { %5518 = vmatpush3.bf16.xpose.msra.mxu0 %v1644_v14  ;;  %5513 = vmatprep.mubr.msk.bf16.mxu1 %vm5996_vm1, %v5995_v7  ;;  %v1103_v11 = vpack.c.bf16 %v1095_v16, %v1095_v16  ;;  %v1305_v35 = vrot.slane %v1297_v17, %v6174_v43  ;;  %v1321_v28 = vrot.slane %v1313_v19, %v6174_v43  ;;  %v386_v58 = vsub.f32 1.0, %v384_v56 }
 0x2a9   : > { %5519 = vmatprep.mubr.msk.bf16.mxu0 %vm5996_vm1, %v5995_v7  ;;  %5523 = vmatprep.subr.bf16.mxu1 %v5995_v7  ;;  %v1104_v29 = vpack.c.bf16 %v1096_v21, %v1096_v21  ;;  %v797_v30 = vpack.c.bf16 %v789_v15, %v789_v15  ;;  %v772_v31 = vrot.slane %v758_v20, %v6174_v43 }
 0x2aa   : > { %5529 = vmatprep.subr.bf16.mxu0 %v5995_v7  ;;  %v788_v36 = vrot.slane %v774_v24, %v6174_v43  ;;  %v798_v22 = vpack.c.bf16 %v790_v27, %v790_v27  ;;  %v1690_v33 = vsel %vm1409_vm2, %v1103_v11, 0  ;;  %v1329_v34 = vcombine.low %v1305_v35, %v1321_v28 }
 0x2ab   : > { %v1736_v38 = vsel %vm1409_vm2, %v1104_v29, 0  ;;  %v1330_v41 = vcombine.high %v1305_v35, %v1321_v28  ;;  %v398_v53 = vrot.slane %v387_v51, %v397_v52  ;;  %v388_v10 = vmul.f32 -1e+09, %v386_v58 }
 0x2ac   : > { %v791_v18 = vcombine.low %v772_v31, %v788_v36  ;;  %v792_v42 = vcombine.high %v772_v31, %v788_v36  ;;  %v1401_v39 = vpack.c.bf16 %v1329_v34, %v1329_v34 }
 0x2ad   : > { %v1402_v40 = vpack.c.bf16 %v1330_v41, %v1330_v41  ;;  %v6385_v55 = vadd.f32 %v398_v53, %v389_v13  ;;  %v6387_v12 = vadd.f32 %v398_v53, %v390_v54  ;;  %v6405_v16 = vadd.f32 %v398_v53, %v391_v0 }
 0x2ae   : > { %5514 = vmatmul.mubr.msk.bf16.vlgmr.msra.gmra.mrb[12].mxu1 %vm1409_vm2, %v797_v30  ;;  %v799_v44 = vpack.c.bf16 %v791_v18, %v791_v18  ;;  %v800_v45 = vpack.c.bf16 %v792_v42, %v792_v42  ;;  %v1879_v46 = vsel %vm1877_vm3, %v1401_v39, 0  ;;  %v6407_v17 = vadd.f32 %v398_v53, %v392_v6 }
 0x2af   : > { %5520 = vmatmul.mubr.msk.bf16.vlgmr.msra.gmra.mrb[8].mxu0 %vm1409_vm2, %v798_v22  ;;  %5524 = vmatpush3.bf16.xpose.msra.mxu1 %v1690_v33  ;;  %v1925_v47 = vsel %vm1877_vm3, %v1402_v40, 0  ;;  %v402_v15 = vrot.slane %v388_v10, %v397_v52 }
 0x2b0   : > { %5530 = vmatpush3.bf16.xpose.msra.mxu0 %v1736_v38  ;;  %5525 = vmatprep.mubr.msk.bf16.mxu1 %vm5996_vm1, %v5995_v7 }
 0x2b1   : > { %5531 = vmatprep.mubr.msk.bf16.mxu0 %vm5996_vm1, %v5995_v7  ;;  %5535 = vmatprep.subr.bf16.mxu1 %v5995_v7  ;;  %v6413_v36 = vadd.f32 %v402_v15, %v389_v13  ;;  %v6415_v22 = vadd.f32 %v402_v15, %v390_v54  ;;  %v6421_v49 = vadd.f32 %v402_v15, %v391_v0 }
 0x2b2   : > { %5541 = vmatprep.subr.bf16.mxu0 %v5995_v7  ;;  %v6423_v50 = vadd.f32 %v402_v15, %v392_v6 }
 0x2b6   : > { %5526 = vmatmul.mubr.msk.bf16.vlgmr.msra.gmra.mrb[16].mxu1 %vm1409_vm2, %v799_v44 }
 0x2b7   : > { %5532 = vmatmul.mubr.msk.bf16.vlgmr.msra.gmra.mrb[12].mxu0 %vm1409_vm2, %v800_v45  ;;  %5536 = vmatpush3.bf16.msra.mxu1 %v1879_v46 }
 0x2b8   : > { %5542 = vmatpush3.bf16.msra.mxu0 %v1925_v47  ;;  %5537 = vmatprep.mubr.msk.bf16.mxu1 %vm5996_vm1, %v5995_v7 }
 0x2b9   : > { %5543 = vmatprep.mubr.msk.bf16.mxu0 %vm5996_vm1, %v5995_v7  ;;  %5547 = vmatprep.subr.bf16.mxu1 %v5995_v7 }
 0x2ba   : > { %5553 = vmatprep.subr.bf16.mxu0 %v5995_v7 }
 0x371   : > { %v1450_v5 = vpop.f32.mrb[4].mxu1 }
 0x372   : > { %v6390_v59 = vadd.f32 %v1450_v5, %v6385_v55  ;;  %v1496_v32 = vpop.f32.mrb[0].mxu0  ;;  %v5491_v60 = vpop.f32.mrb[5].mxu1 }
 0x373   : > { %v6393_v61 = vadd.f32 %v1496_v32, %v6387_v12  ;;  %v5497_v62 = vpop.f32.mrb[1].mxu0  ;;  %v1453_v63 = vpop.f32.mrb[6].mxu1 }
 0x374   : > { %v1499_v1 = vpop.f32.mrb[2].mxu0  ;;  %v5492_v3 = vpop.f32.mrb[7].mxu1  ;;  %v1778_v4 = vsel %vm1409_vm2, %v6390_v59, -inf }
 0x375   : > { %v5498_v8 = vpop.f32.mrb[3].mxu0  ;;  %v1781_v9 = vsel %vm1409_vm2, %v6393_v61, -inf  ;;  %1779 = vmax.xlane.f32.xlu1 %v1778_v4 }
 0x376   : > { %1782 = vmax.xlane.f32.xlu0 %v1781_v9 }
 0x379   : > { %v1542_v19 = vpop.f32.mrb[8].mxu1 }
 0x37a   : > { %v1543_v14 = vadd.f32 %v1542_v19, %v6405_v16  ;;  %v1588_v21 = vpop.f32.mrb[4].mxu0  ;;  %v5503_v20 = vpop.f32.mrb[9].mxu1 }
 0x37b   : > { %v1589_v24 = vadd.f32 %v1588_v21, %v6407_v17  ;;  %v5509_v27 = vpop.f32.mrb[5].mxu0  ;;  %v1545_v11 = vpop.f32.mrb[10].mxu1 }
 0x37c   : > { %v1591_v35 = vpop.f32.mrb[6].mxu0  ;;  %v5504_v28 = vpop.f32.mrb[11].mxu1  ;;  %v1784_v29 = vsel %vm1409_vm2, %v1543_v14, -inf }
 0x37d   : > { %v5510_v30 = vpop.f32.mrb[7].mxu0  ;;  %v1787_v31 = vsel %vm1409_vm2, %v1589_v24, -inf  ;;  %1785 = vmax.xlane.f32.xlu0 %v1784_v29 }
 0x37e   : > { %1788 = vmax.xlane.f32.xlu1 %v1787_v31 }
 0x381   : > { %v1634_v33 = vpop.f32.mrb[12].mxu1 }
 0x382   : > { %v1635_v34 = vadd.f32 %v1634_v33, %v6413_v36  ;;  %v1680_v38 = vpop.f32.mrb[8].mxu0  ;;  %v5515_v41 = vpop.f32.mrb[13].mxu1 }
 0x383   : > { %v1681_v18 = vadd.f32 %v1680_v38, %v6415_v22  ;;  %v5521_v42 = vpop.f32.mrb[9].mxu0  ;;  %v1637_v39 = vpop.f32.mrb[14].mxu1 }
 0x384   : > { %v1683_v40 = vpop.f32.mrb[10].mxu0  ;;  %v5516_v44 = vpop.f32.mrb[15].mxu1  ;;  %v1790_v45 = vsel %vm1409_vm2, %v1635_v34, -inf }
 0x385   : > { %v5522_v46 = vpop.f32.mrb[11].mxu0  ;;  %v1793_v47 = vsel %vm1409_vm2, %v1681_v18, -inf  ;;  %1791 = vmax.xlane.f32.xlu0 %v1790_v45 }
 0x386   : > { %1794 = vmax.xlane.f32.xlu1 %v1793_v47 }
 0x389   : > { %v1726_v51 = vpop.f32.mrb[16].mxu1 }
 0x38a   : > { %v6426_v52 = vadd.f32 %v1726_v51, %v6421_v49  ;;  %v1772_v53 = vpop.f32.mrb[12].mxu0  ;;  %v5527_v13 = vpop.f32.mrb[17].mxu1 }
 0x38b   : > { %v1773_v54 = vadd.f32 %v1772_v53, %v6423_v50  ;;  %v5533_v56 = vpop.f32.mrb[13].mxu0  ;;  %v1729_v5 = vpop.f32.mrb[18].mxu1 }
 0x38c   : > { %v1775_v58 = vpop.f32.mrb[14].mxu0  ;;  %v5528_v32 = vpop.f32.mrb[19].mxu1  ;;  %v1796_v60 = vsel %vm1409_vm2, %v6426_v52, -inf }
 0x38d   : > { %v5534_v62 = vpop.f32.mrb[15].mxu0  ;;  %v1799_v63 = vsel %vm1409_vm2, %v1773_v54, -inf  ;;  %1797 = vmax.xlane.f32.xlu0 %v1796_v60 }
 0x38e   : > { %1800 = vmax.xlane.f32.xlu1 %v1799_v63  ;;  %v1403_v62 = vpack.c.bf16 %v6344_v26, %v6344_v26 }
 0x39f   : > { %1111 = vrot.lane.b32.xlu1 %v6180_v48, %s6003_s11 }
 0x3a3   : > { %1107 = vrot.lane.b32.xlu0 %v6151_v25, %s6003_s11 }
 0x402   : > { %v1780_v0 = vpop.xlane.xlu1 %1779 }
 0x403   : > { %v1783_v1 = vpop.xlane.xlu0 %1782  ;;  %v1802_v3 = vsub.f32 %v6390_v59, %v1780_v0  ;;  %v1404_v0 = vpack.c.bf16 %v6338_v23, %v6338_v23 }
 0x404   : > { %v1803_v4 = vsub.f32 %v6393_v61, %v1783_v1 }
 0x405   : > { %v1810_v6 = vmul.f32 1.442695, %v1802_v3 }
 0x406   : > { %v1812_v8 = vmul.f32 1.442695, %v1803_v4  ;;  %v1971_v4 = vsel %vm1877_vm3, %v1403_v62, 0 }
 0x407   : > { %5849 = vpow2.f32 %v1810_v6 }
 0x408   : > { %5851 = vpow2.f32 %v1812_v8  ;;  %v2017_v8 = vsel %vm1877_vm3, %v1404_v0, 0 }
 0x40a   : > { %v1786_v9 = vpop.xlane.xlu0 %1785 }
 0x40b   : > { %v1789_v10 = vpop.xlane.xlu1 %1788  ;;  %v1804_v19 = vsub.f32 %v1543_v14, %v1786_v9 }
 0x40c   : > { %v1805_v21 = vsub.f32 %v1589_v24, %v1789_v10 }
 0x40d   : > { %v1814_v20 = vmul.f32 1.442695, %v1804_v19 }
 0x40e   : > { %v1816_v15 = vmul.f32 1.442695, %v1805_v21 }
 0x40f   : > { %5853 = vpow2.f32 %v1814_v20 }
 0x410   : > { %5855 = vpow2.f32 %v1816_v15 }
 0x411   : > { %v5850_v48 = vpop.eup %5849 }
 0x412   : > { %v5852_v25 = vpop.eup %5851  ;;  %v1792_v27 = vpop.xlane.xlu0 %1791  ;;  %v1826_v11 = vsel %vm1409_vm2, %v5850_v48, 0.0 }
 0x413   : > { %v1795_v59 = vpop.xlane.xlu1 %1794  ;;  %v1806_v35 = vsub.f32 %v1635_v34, %v1792_v27  ;;  %v1829_v61 = vsel %vm1409_vm2, %v5852_v25, 0.0  ;;  %1827 = vadd.xlane.f32.xlu0 %v1826_v11 }
 0x414   : > { %v1807_v28 = vsub.f32 %v1681_v18, %v1795_v59  ;;  %1830 = vadd.xlane.f32.xlu1 %v1829_v61 }
 0x415   : > { %v1818_v29 = vmul.f32 1.442695, %v1806_v35 }
 0x416   : > { %v1820_v30 = vmul.f32 1.442695, %v1807_v28 }
 0x417   : > { %5857 = vpow2.f32 %v1818_v29 }
 0x418   : > { %5859 = vpow2.f32 %v1820_v30 }
 0x419   : > { %v5854_v14 = vpop.eup %5853 }
 0x41a   : > { %v5856_v24 = vpop.eup %5855  ;;  %v1832_v31 = vsel %vm1409_vm2, %v5854_v14, 0.0  ;;  %v1798_v39 = vpop.xlane.xlu0 %1797 }
 0x41b   : > { %1833 = vadd.xlane.f32.xlu1 %v1832_v31  ;;  %v1835_v33 = vsel %vm1409_vm2, %v5856_v24, 0.0  ;;  %v1801_v42 = vpop.xlane.xlu1 %1800  ;;  %v1808_v44 = vsub.f32 %v6426_v52, %v1798_v39 }
 0x41c   : > { %1836 = vadd.xlane.f32.xlu0 %v1835_v33  ;;  %v1809_v40 = vsub.f32 %v1773_v54, %v1801_v42 }
 0x41d   : > { %v1822_v46 = vmul.f32 1.442695, %v1808_v44 }
 0x41e   : > { %v1824_v45 = vmul.f32 1.442695, %v1809_v40 }
 0x41f   : > { %v1112_v13 = vpop.permute.xlu1 %1111 }
 0x420   : > { %5861 = vpow2.f32 %v1824_v45 }
 0x421   : > { %v6442_v38 = vpop.eup %5857  ;;  %5863 = vpow2.f32 %v1822_v46 }
 0x422   : > { %v6444_v34 = vpop.eup %5859  ;;  %v1838_v41 = vsel %vm1409_vm2, %v6442_v38, 0.0 }
 0x423   : > { %v1841_v18 = vsel %vm1409_vm2, %v6444_v34, 0.0  ;;  %1839 = vadd.xlane.f32.xlu0 %v1838_v41 }
 0x424   : > { %1842 = vadd.xlane.f32.xlu1 %v1841_v18 }
 0x42a   : > { %v6455_v47 = vpop.eup %5861 }
 0x42b   : > { %v6457_v51 = vpop.eup %5863  ;;  %v1847_v53 = vsel %vm1409_vm2, %v6455_v47, 0.0 }
 0x435   : > { %1115 = vrot.lane.b32.xlu1 %v6190_v57, %s6003_s11  ;;  %v1844_v57 = vsel %vm1409_vm2, %v6457_v51, 0.0 }
 0x439   : > { %1119 = vrot.lane.b32.xlu0 %v6198_v2, %s6003_s11  ;;  %v1108_v2 = vpop.permute.xlu0 %1107 }
 0x458   : > { %1848 = vadd.xlane.f32.xlu0 %v1847_v53 }
 0x459   : > { %1845 = vadd.xlane.f32.xlu1 %v1844_v57 }
 0x4a0   : > { %v1828_v54 = vpop.xlane.xlu0 %1827 }
 0x4a1   : > { %v1831_v52 = vpop.xlane.xlu1 %1830  ;;  %5865 = vrcp.f32 %v1828_v54 }
 0x4a2   : > { %5867 = vrcp.f32 %v1831_v52 }
 0x4a8   : > { %v1834_v56 = vpop.xlane.xlu1 %1833 }
 0x4a9   : > { %5869 = vrcp.f32 %v1834_v56  ;;  %v1837_v5 = vpop.xlane.xlu0 %1836 }
 0x4aa   : > { %5871 = vrcp.f32 %v1837_v5 }
 0x4ab   : > { %v5866_v58 = vpop.eup %5865 }
 0x4ac   : > { %v5868_v32 = vpop.eup %5867  ;;  %v1858_v60 = vmul.f32 %v5866_v58, %v5850_v48 }
 0x4ad   : > { %v1859_v63 = vmul.f32 %v5868_v32, %v5852_v25 }
 0x4ae   : > { %v1866_v1 = vpack.c.bf16 %v1858_v60, %v1858_v60 }
 0x4af   : > { %v1867_v3 = vpack.c.bf16 %v1859_v63, %v1859_v63 }
 0x4b0   : > { %5538 = vmatmul.mubr.msk.bf16.vlgmr.msra.gmra.mrb[20].mxu1 %vm1409_vm2, %v1866_v1  ;;  %v1840_v6 = vpop.xlane.xlu0 %1839 }
 0x4b1   : > { %5544 = vmatmul.mubr.msk.bf16.vlgmr.msra.gmra.mrb[16].mxu0 %vm1409_vm2, %v1867_v3  ;;  %v1843_v9 = vpop.xlane.xlu1 %1842  ;;  %5548 = vmatpush3.bf16.msra.mxu1 %v1971_v4  ;;  %5873 = vrcp.f32 %v1840_v6 }
 0x4b2   : > { %5554 = vmatpush3.bf16.msra.mxu0 %v2017_v8  ;;  %5549 = vmatprep.mubr.msk.bf16.mxu1 %vm5996_vm1, %v5995_v7  ;;  %5875 = vrcp.f32 %v1843_v9 }
 0x4b3   : > { %v5870_v26 = vpop.eup %5869  ;;  %5555 = vmatprep.mubr.msk.bf16.mxu0 %vm5996_vm1, %v5995_v7  ;;  %5559 = vmatprep.subr.bf16.mxu1 %v5995_v7 }
 0x4b4   : > { %v5872_v23 = vpop.eup %5871  ;;  %v1860_v10 = vmul.f32 %v5870_v26, %v5854_v14  ;;  %v1120_v19 = vpop.permute.xlu0 %1119  ;;  %5565 = vmatprep.subr.bf16.mxu0 %v5995_v7 }
 0x4b5   : > { %v1861_v21 = vmul.f32 %v5872_v23, %v5856_v24  ;;  %v1116_v20 = vpop.permute.xlu1 %1115  ;;  %v1213_v15 = vcombine.low %v1112_v13, %v1120_v19  ;;  %v1214_v48 = vcombine.high %v1112_v13, %v1120_v19 }
 0x4b6   : > { %v1197_v25 = vcombine.low %v1108_v2, %v1116_v20  ;;  %v1198_v27 = vcombine.high %v1108_v2, %v1116_v20  ;;  %v1868_v11 = vpack.c.bf16 %v1860_v10, %v1860_v10 }
 0x4b7   : > { %v1221_v59 = vrot.slane %v1213_v15, %v6168_v37  ;;  %v1228_v35 = vrot.slane %v1214_v48, %v6168_v37  ;;  %v1869_v61 = vpack.c.bf16 %v1861_v21, %v1861_v21 }
 0x4b8   : > { %v1205_v28 = vrot.slane %v1197_v25, %v6168_v37  ;;  %v1212_v29 = vrot.slane %v1198_v27, %v6168_v37  ;;  %5550 = vmatmul.mubr.msk.bf16.vlgmr.msra.gmra.mrb[24].mxu1 %vm1409_vm2, %v1868_v11 }
 0x4b9   : > { %5556 = vmatmul.mubr.msk.bf16.vlgmr.msra.gmra.mrb[20].mxu0 %vm1409_vm2, %v1869_v61  ;;  %5561 = vmatprep.mubr.msk.bf16.mxu1 %vm5996_vm1, %v5995_v7 }
 0x4ba   : > { %v1229_v30 = vcombine.low %v1205_v28, %v1221_v59  ;;  %v1230_v14 = vcombine.high %v1205_v28, %v1221_v59  ;;  %v1245_v24 = vcombine.low %v1212_v29, %v1228_v35  ;;  %v1246_v31 = vcombine.high %v1212_v29, %v1228_v35  ;;  %5567 = vmatprep.mubr.msk.bf16.mxu0 %vm5996_vm1, %v5995_v7 }
 0x4bb   : > { %v5874_v32 = vpop.eup %5873 }
 0x4bc   : > { %v1237_v33 = vrot.slane %v1229_v30, %v6174_v43  ;;  %v1244_v41 = vrot.slane %v1230_v14, %v6174_v43  ;;  %v1253_v18 = vrot.slane %v1245_v24, %v6174_v43  ;;  %v1260_v42 = vrot.slane %v1246_v31, %v6174_v43  ;;  %v5876_v63 = vpop.eup %5875 }
 0x4bd   : > { %v1863_v6 = vmul.f32 %v5876_v63, %v6444_v34  ;;  %v1862_v8 = vmul.f32 %v5874_v32, %v6442_v38 }
 0x4be   : > { %v1333_v39 = vcombine.low %v1237_v33, %v1244_v41  ;;  %v5276_v40 = vcombine.high %v1237_v33, %v1244_v41  ;;  %v1349_v44 = vcombine.low %v1253_v18, %v1260_v42  ;;  %v5277_v45 = vcombine.high %v1253_v18, %v1260_v42 }
 0x4bf   : > { %v1870_v20 = vpack.c.bf16 %v1862_v8, %v1862_v8  ;;  %v1871_v15 = vpack.c.bf16 %v1863_v6, %v1863_v6 }
 0x4c0   : > { %v1340_v46 = vrot.slane %v1333_v39, %v6168_v37  ;;  %v1348_v53 = vrot.slane %v5276_v40, %v6168_v37  ;;  %v1356_v57 = vrot.slane %v1349_v44, %v6168_v37  ;;  %v1364_v2 = vrot.slane %v5277_v45, %v6168_v37 }
 0x4c2   : > { %v1365_v13 = vcombine.low %v1340_v46, %v1348_v53  ;;  %v1366_v54 = vcombine.high %v1340_v46, %v1348_v53  ;;  %v1381_v52 = vcombine.low %v1356_v57, %v1364_v2  ;;  %v1382_v56 = vcombine.high %v1356_v57, %v1364_v2 }
 0x4c4   : > { %v1373_v5 = vrot.slane %v1365_v13, %v6174_v43  ;;  %v1380_v58 = vrot.slane %v1366_v54, %v6174_v43  ;;  %v1389_v60 = vrot.slane %v1381_v52, %v6174_v43  ;;  %v1396_v62 = vrot.slane %v1382_v56, %v6174_v43 }
 0x4c6   : > { %v1397_v0 = vcombine.low %v1373_v5, %v1389_v60  ;;  %v1398_v1 = vcombine.high %v1373_v5, %v1389_v60  ;;  %v1399_v3 = vcombine.low %v1380_v58, %v1396_v62  ;;  %v1400_v4 = vcombine.high %v1380_v58, %v1396_v62 }
 0x4c8   : > { %v1405_v9 = vpack.c.bf16 %v1397_v0, %v1397_v0  ;;  %v1406_v26 = vpack.c.bf16 %v1398_v1, %v1398_v1  ;;  %v1407_v19 = vpack.c.bf16 %v1399_v3, %v1399_v3  ;;  %v1408_v21 = vpack.c.bf16 %v1400_v4, %v1400_v4 }
 0x4ca   : > { %v2063_v23 = vsel %vm1877_vm3, %v1405_v9, 0  ;;  %v2109_v10 = vsel %vm1877_vm3, %v1406_v26, 0  ;;  %v2155_v38 = vsel %vm1877_vm3, %v1407_v19, 0  ;;  %v2201_v34 = vsel %vm1877_vm3, %v1408_v21, 0 }
 0x4cb   : > { %5560 = vmatpush3.bf16.msra.mxu1 %v2063_v23  ;;  %5566 = vmatpush3.bf16.msra.mxu0 %v2109_v10 }
 0x4cc   : > { %5571 = vmatprep.subr.bf16.mxu1 %v5995_v7  ;;  %5577 = vmatprep.subr.bf16.mxu0 %v5995_v7 }
 0x4ce   : > { %5562 = vmatmul.mubr.msk.bf16.vlgmr.msra.gmra.mrb[28].mxu1 %vm1409_vm2, %v1870_v20  ;;  %5568 = vmatmul.mubr.msk.bf16.vlgmr.msra.gmra.mrb[24].mxu0 %vm1409_vm2, %v1871_v15 }
 0x4cf   : > { %5572 = vmatpush3.bf16.msra.mxu1 %v2155_v38  ;;  %5578 = vmatpush3.bf16.msra.mxu0 %v2201_v34 }
 0x4d0   : > { %5573 = vmatprep.mubr.msk.bf16.mxu1 %vm5996_vm1, %v5995_v7  ;;  %5579 = vmatprep.mubr.msk.bf16.mxu0 %vm5996_vm1, %v5995_v7 }
 0x4d1   : > { %5583 = vmatprep.subr.bf16.mxu1 %v5995_v7  ;;  %5591 = vmatprep.subr.bf16.mxu0 %v5995_v7 }
 0x4e5   : > { %v1849_v48 = vpop.xlane.xlu0 %1848 }
 0x4e6   : > { %v1846_v25 = vpop.xlane.xlu1 %1845  ;;  %5877 = vrcp.f32 %v1849_v48 }
 0x4e7   : > { %5879 = vrcp.f32 %v1846_v25 }
 0x4f0   : > { %v5878_v27 = vpop.eup %5877 }
 0x4f1   : > { %v5880_v11 = vpop.eup %5879  ;;  %v1865_v59 = vmul.f32 %v5878_v27, %v6455_v47 }
 0x4f2   : > { %v1864_v35 = vmul.f32 %v5880_v11, %v6457_v51 }
 0x4f3   : > { %v1873_v61 = vpack.c.bf16 %v1865_v59, %v1865_v59 }
 0x4f4   : > { %v1872_v28 = vpack.c.bf16 %v1864_v35, %v1864_v35 }
 0x4f5   : > { %5580 = vmatmul.mubr.msk.bf16.vlgmr.msra.gmra.mrb[28].mxu0 %vm1409_vm2, %v1873_v61 }
 0x4f6   : > { %5574 = vmatmul.mubr.msk.bf16.vlgmr.msra.gmra.mrb[32].mxu1 %vm1409_vm2, %v1872_v28  ;;  %5595 = vmatprep.mubr.msk.bf16.mxu0 %vm5996_vm1, %v5995_v7 }
 0x4f7   : > { %5587 = vmatprep.mubr.msk.bf16.mxu1 %vm5996_vm1, %v5995_v7 }
 0x583   : > { %v1915_v29 = vpop.f32.mrb[20].mxu1 }
 0x584   : > { %v1961_v30 = vpop.f32.mrb[16].mxu0  ;;  %v5539_v14 = vpop.f32.mrb[21].mxu1 }
 0x585   : > { %v5545_v24 = vpop.f32.mrb[17].mxu0  ;;  %v1918_v31 = vpop.f32.mrb[22].mxu1 }
 0x586   : > { %v1964_v47 = vpop.f32.mrb[18].mxu0  ;;  %v5540_v33 = vpop.f32.mrb[23].mxu1 }
 0x587   : > { %v5546_v51 = vpop.f32.mrb[19].mxu0 }
 0x58b   : > { %v2007_v41 = vpop.f32.mrb[24].mxu1 }
 0x58c   : > { %v2243_v18 = vcombine.low %v1915_v29, %v2007_v41  ;;  %v2244_v42 = vcombine.high %v1915_v29, %v2007_v41  ;;  %v2053_v39 = vpop.f32.mrb[20].mxu0  ;;  %v5551_v40 = vpop.f32.mrb[25].mxu1 }
 0x58d   : > { %v2259_v44 = vcombine.low %v1961_v30, %v2053_v39  ;;  %v2260_v45 = vcombine.high %v1961_v30, %v2053_v39  ;;  %v5557_v46 = vpop.f32.mrb[21].mxu0  ;;  %v2010_v53 = vpop.f32.mrb[26].mxu1 }
 0x58e   : > { %v2251_v57 = vrot.slane %v2243_v18, %v6168_v37  ;;  %v2258_v2 = vrot.slane %v2244_v42, %v6168_v37  ;;  %v2056_v13 = vpop.f32.mrb[22].mxu0  ;;  %v5552_v54 = vpop.f32.mrb[27].mxu1 }
 0x58f   : > { %v2267_v52 = vrot.slane %v2259_v44, %v6168_v37  ;;  %v2274_v56 = vrot.slane %v2260_v45, %v6168_v37  ;;  %v5558_v5 = vpop.f32.mrb[23].mxu0 }
 0x591   : > { %v2275_v58 = vcombine.low %v2251_v57, %v2267_v52  ;;  %v2276_v32 = vcombine.high %v2251_v57, %v2267_v52  ;;  %v2291_v60 = vcombine.low %v2258_v2, %v2274_v56  ;;  %v2292_v62 = vcombine.high %v2258_v2, %v2274_v56 }
 0x593   : > { %v2283_v63 = vrot.slane %v2275_v58, %v6174_v43  ;;  %v2290_v0 = vrot.slane %v2276_v32, %v6174_v43  ;;  %v2299_v1 = vrot.slane %v2291_v60, %v6174_v43  ;;  %v2306_v3 = vrot.slane %v2292_v62, %v6174_v43 }
 0x595   : > { %v2379_v4 = vcombine.low %v2283_v63, %v2290_v0  ;;  %v5294_v6 = vcombine.high %v2283_v63, %v2290_v0  ;;  %v2395_v8 = vcombine.low %v2299_v1, %v2306_v3  ;;  %v5295_v9 = vcombine.high %v2299_v1, %v2306_v3 }
 0x597   : > { %v2386_v26 = vrot.slane %v2379_v4, %v6168_v37  ;;  %v2394_v23 = vrot.slane %v5294_v6, %v6168_v37  ;;  %v2402_v10 = vrot.slane %v2395_v8, %v6168_v37  ;;  %v2410_v19 = vrot.slane %v5295_v9, %v6168_v37  ;;  %v5827_v9 = vld [vmem:[%s7174_s5] sm:$0xff]  }
 0x598   : > { %5584 = vmatpush3.bf16.msra.mxu1 %v5827_v9 }
 0x599   : > { %v2412_v21 = vcombine.high %v2386_v26, %v2394_v23  ;;  %v2428_v20 = vcombine.high %v2402_v10, %v2410_v19  ;;  %v2411_v15 = vcombine.low %v2386_v26, %v2394_v23  ;;  %v2427_v38 = vcombine.low %v2402_v10, %v2410_v19  ;;  %5585 = vmatprep.subr.bf16.mxu1 %v5995_v7 }
 0x59b   : > { %v6536_v34 = vrot.slane %v2412_v21, %v6174_v43  ;;  %v6539_v48 = vrot.slane %v2428_v20, %v6174_v43  ;;  %v6542_v25 = vrot.slane %v2411_v15, %v6174_v43  ;;  %v6545_v27 = vrot.slane %v2427_v38, %v6174_v43 }
 0x59d   : > { %v2445_v11 = vcombine.low %v6536_v34, %v6539_v48  ;;  %v2443_v59 = vcombine.low %v6542_v25, %v6545_v27  ;;  %v2444_v35 = vcombine.high %v6542_v25, %v6545_v27  ;;  %v2446_v61 = vcombine.high %v6536_v34, %v6539_v48 }
 0x5a1   : > { %v2099_v28 = vpop.f32.mrb[28].mxu1  ;;  %v2145_v29 = vpop.f32.mrb[24].mxu0 }
 0x5a2   : > { %v5563_v30 = vpop.f32.mrb[29].mxu1  ;;  %v5569_v14 = vpop.f32.mrb[25].mxu0 }
 0x5a3   : > { %v2102_v24 = vpop.f32.mrb[30].mxu1  ;;  %v2148_v31 = vpop.f32.mrb[26].mxu0  ;;  %v5828_v30 = vld [vmem:[%s7174_s5 + $0x8] sm:$0xff]  }
 0x5a4   : > { %v5564_v47 = vpop.f32.mrb[31].mxu1  ;;  %v5570_v33 = vpop.f32.mrb[27].mxu0  ;;  %5586 = vmatpush3.bf16.msra.mxu1 %v5828_v30 }
 0x5a5   : > { %5599 = vmatprep.subr.bf16.mxu1 %v5995_v7 }
 0x5c8   : > { %v2237_v51 = vpop.f32.mrb[28].mxu0 }
 0x5c9   : > { %v2191_v41 = vpop.f32.mrb[32].mxu1  ;;  %v2327_v18 = vcombine.low %v2145_v29, %v2237_v51  ;;  %v2328_v42 = vcombine.high %v2145_v29, %v2237_v51  ;;  %v5581_v39 = vpop.f32.mrb[29].mxu0 }
 0x5ca   : > { %v2311_v40 = vcombine.low %v2099_v28, %v2191_v41  ;;  %v2312_v44 = vcombine.high %v2099_v28, %v2191_v41  ;;  %v5575_v45 = vpop.f32.mrb[33].mxu1  ;;  %v2240_v46 = vpop.f32.mrb[30].mxu0 }
 0x5cb   : > { %v2335_v53 = vrot.slane %v2327_v18, %v6168_v37  ;;  %v2342_v57 = vrot.slane %v2328_v42, %v6168_v37  ;;  %v2194_v2 = vpop.f32.mrb[34].mxu1  ;;  %v5582_v13 = vpop.f32.mrb[31].mxu0 }
 0x5cc   : > { %v2319_v54 = vrot.slane %v2311_v40, %v6168_v37  ;;  %v2326_v52 = vrot.slane %v2312_v44, %v6168_v37  ;;  %v5576_v56 = vpop.f32.mrb[35].mxu1 }
 0x5ce   : > { %v2343_v5 = vcombine.low %v2319_v54, %v2335_v53  ;;  %v2344_v58 = vcombine.high %v2319_v54, %v2335_v53  ;;  %v2359_v32 = vcombine.low %v2326_v52, %v2342_v57  ;;  %v2360_v60 = vcombine.high %v2326_v52, %v2342_v57 }
 0x5d0   : > { %v2351_v62 = vrot.slane %v2343_v5, %v6174_v43  ;;  %v2358_v63 = vrot.slane %v2344_v58, %v6174_v43  ;;  %v2367_v0 = vrot.slane %v2359_v32, %v6174_v43  ;;  %v2374_v1 = vrot.slane %v2360_v60, %v6174_v43  ;;  %v5930_v58 = vld [vmem:[%s6119_s29 + $0x8] sm:$0xff] }
 0x5d2   : > { %v2447_v3 = vcombine.low %v2351_v62, %v2358_v63  ;;  %v5296_v4 = vcombine.high %v2351_v62, %v2358_v63  ;;  %v2463_v6 = vcombine.low %v2367_v0, %v2374_v1  ;;  %v5297_v8 = vcombine.high %v2367_v0, %v2374_v1 }
 0x5d4   : > { %v2454_v26 = vrot.slane %v2447_v3, %v6168_v37  ;;  %v2462_v23 = vrot.slane %v5296_v4, %v6168_v37  ;;  %v2470_v10 = vrot.slane %v2463_v6, %v6168_v37  ;;  %v2478_v19 = vrot.slane %v5297_v8, %v6168_v37  ;;  %v5829_v3 = vld [vmem:[%s7176_s7] sm:$0xff]   ;;  %v5830_v4 = vld [vmem:[%s7176_s7 + $0x8] sm:$0xff]  }
 0x5d5   : > { %5592 = vmatpush3.bf16.msra.mxu0 %v5829_v3  ;;  %v5831_v6 = vld [vmem:[%s7177_s8] sm:$0xff]   ;;  %v5832_v8 = vld [vmem:[%s7177_s8 + $0x8] sm:$0xff]  }
 0x5d6   : > { %v2480_v21 = vcombine.high %v2454_v26, %v2462_v23  ;;  %v2496_v20 = vcombine.high %v2470_v10, %v2478_v19  ;;  %v2479_v15 = vcombine.low %v2454_v26, %v2462_v23  ;;  %v2495_v38 = vcombine.low %v2470_v10, %v2478_v19  ;;  %5593 = vmatprep.subr.bf16.mxu0 %v5995_v7 }
 0x5d8   : > { %v2494_v34 = vrot.slane %v2480_v21, %v6174_v43  ;;  %v2510_v48 = vrot.slane %v2496_v20, %v6174_v43  ;;  %v2487_v28 = vrot.slane %v2479_v15, %v6174_v43  ;;  %v2503_v29 = vrot.slane %v2495_v38, %v6174_v43 }
 0x5d9   : > { %5594 = vmatpush3.bf16.msra.mxu0 %v5830_v4 }
 0x5da   : > { %v2513_v14 = vcombine.low %v2494_v34, %v2510_v48  ;;  %v2512_v24 = vcombine.high %v2487_v28, %v2503_v29  ;;  %v2511_v31 = vcombine.low %v2487_v28, %v2503_v29  ;;  %v2514_v47 = vcombine.high %v2494_v34, %v2510_v48  ;;  %5611 = vmatprep.subr.bf16.mxu0 %v5995_v7  ;;  %v5301_v34 = vld [vmem:[%s7175_s6] ss:$0 sm:$0xff] }
 0x5dc   : > { %v5800_v33 = vpack.i.bf16 %v2513_v14, %v2445_v11  ;;  %v5795_v51 = vpack.i.bf16 %v2512_v24, %v2444_v35  ;;  %v5805_v41 = vpack.i.bf16 %v2514_v47, %v2446_v61  ;;  %v5833_v14 = vld [vmem:[%s7177_s8 + $0x10] sm:$0xff]   ;;  %v5834_v24 = vld [vmem:[%s7177_s8 + $0x18] sm:$0xff]  }
 0x5de   : > { %5801 = vrot.lane.b32.xlu1 %v5800_v33, %s6004_s25  ;;  %5796 = vrot.lane.b32.xlu0 %v5795_v51, %s7187_s26  ;;  %s7195_s26 = smov 24  }
 0x5e2   : > { %5806 = vrot.lane.b32.xlu1 %v5805_v41, %s7186_s27 }
 0x650   : > { %v5802_v18 = vpop.permute.xlu1 %5801  ;;  %v5797_v42 = vpop.permute.xlu0 %5796 }
 0x651   : > { %v5799_v39 = vunpack.i.h.bf16 %v5797_v42  ;;  %v5798_v40 = vunpack.i.l.bf16 %v5797_v42  ;;  %v5804_v44 = vunpack.i.h.bf16 %v5802_v18  ;;  %v5803_v45 = vunpack.i.l.bf16 %v5802_v18 }
 0x653   : > { %v2539_v11 = vsel %vm1409_vm2, %v2443_v59, %v5798_v40  ;;  %v2540_v35 = vsel %vm1409_vm2, %v2511_v31, %v5799_v39  ;;  %v5929_v59 = vld [vmem:[%s6119_s29] sm:$0xff]  ;;  %s7193_s29 = smov 96  }
 0x654   : > { %v5807_v61 = vpop.permute.xlu1 %5806  ;;  %v2542_v57 = vsel %vm2541_vm4, %v2539_v11, %v5803_v45  ;;  %v2543_v2 = vsel %vm2541_vm4, %v2540_v35, %v5804_v44 }
 0x655   : > { %v5809_v46 = vunpack.i.h.bf16 %v5807_v61  ;;  %v5808_v53 = vunpack.i.l.bf16 %v5807_v61 }
 0x657   : > { %v2545_v13 = vsel %vm2544_vm5, %v2542_v57, %v5808_v53  ;;  %v2546_v54 = vsel %vm2544_vm5, %v2543_v2, %v5809_v46  ;;  %v5835_v2 = vld [vmem:[%s7173_s4 + $0x10] sm:$0xff]  }
 0x658   : > { %v2547_v25 = vpack.c.bf16 %v2546_v54, %v2545_v13  ;;  %v5836_v13 = vld [vmem:[%s7173_s4 + $0x18] sm:$0xff]  }
 0x65a   : > { %5588 = vmatmul.mubr.msk.bf16.vlgmr.msra.gmra.mrb[36].mxu1 %vm416_vm0, %v2547_v25 }
 0x65b   : > { %5607 = vmatprep.mubr.msk.bf16.mxu1 %vm5996_vm1, %v5995_v7  ;;  %5600 = vmatpush3.bf16.msra.mxu1 %v5831_v6 }
 0x65c   : > { %5601 = vmatprep.subr.bf16.mxu1 %v5995_v7 }
 0x65f   : > { %5602 = vmatpush3.bf16.msra.mxu1 %v5832_v8 }
 0x660   : > { %5603 = vmatprep.subr.bf16.mxu1 %v5995_v7 }
 0x663   : > { %5604 = vmatpush3.bf16.msra.mxu1 %v5833_v14 }
 0x664   : > { %5605 = vmatprep.subr.bf16.mxu1 %v5995_v7 }
 0x667   : > { %5606 = vmatpush3.bf16.msra.mxu1 %v5834_v24 }
 0x668   : > { %5625 = vmatprep.subr.bf16.mxu1 %v5995_v7 }
 0x72d   : > { %v2601_v27 = vpop.f32.mrb[36].mxu1 }
 0x72e   : > { %v2608_v52 = vadd.f32 %v5929_v59, %v2601_v27  ;;  %v5589_v56 = vpop.f32.mrb[37].mxu1 }
 0x72f   : > { %v2604_v5 = vpop.f32.mrb[38].mxu1 }
 0x730   : > { %v2609_v32 = vadd.f32 %v5930_v58, %v2604_v5  ;;  %v5590_v60 = vpop.f32.mrb[39].mxu1  ;;  %v2611_v62 = vmul.f32 %v2608_v52, %v2608_v52 }
 0x731   : > { %v5311_v60 = vld [vmem:[%s7172_s3 + $0x1] ss:$0 sm:$0xff] }
 0x732   : > { %v2613_v63 = vsel %vm416_vm0, %v2611_v62, 0.0  ;;  %v2612_v0 = vmul.f32 %v2609_v32, %v2609_v32 }
 0x733   : > { %2614 = vadd.xlane.f32.xlu0 %v2613_v63 }
 0x734   : > { %v2616_v1 = vsel %vm416_vm0, %v2612_v0, 0.0 }
 0x735   : > { %2617 = vadd.xlane.f32.xlu1 %v2616_v1 }
 0x7c0   : > { %v2615_v9 = vpop.xlane.xlu0 %2614 }
 0x7c1   : > { %v2619_v26 = vmul.f32 0.03125, %v2615_v9 }
 0x7c2   : > { %v2618_v23 = vpop.xlane.xlu1 %2617 }
 0x7c3   : > { %v2621_v10 = vadd.f32 1e-06, %v2619_v26  ;;  %v2620_v19 = vmul.f32 0.03125, %v2618_v23 }
 0x7c5   : > { %5881 = vrsqrt.f32 %v2621_v10  ;;  %v2622_v21 = vadd.f32 1e-06, %v2620_v19 }
 0x7c7   : > { %5883 = vrsqrt.f32 %v2622_v21 }
 0x7cf   : > { %v5882_v20 = vpop.eup %5881 }
 0x7d0   : > { %v2625_v15 = vmul.f32 %v5882_v20, %v2608_v52 }
 0x7d1   : > { %v5884_v38 = vpop.eup %5883 }
 0x7d2   : > { %v2626_v48 = vmul.f32 %v5884_v38, %v2609_v32  ;;  %v2633_v28 = vmul.f32 %v5301_v34, %v2625_v15 }
 0x7d4   : > { %v2634_v29 = vmul.f32 %v5301_v34, %v2626_v48 }
 0x7d6   : > { %v2635_v30 = vpack.c.bf16 %v2634_v29, %v2633_v28 }
 0x7d8   : > { %5596 = vmatmul.mubr.msk.bf16.vlgmr.msra.gmra.mrb[32].mxu0 %vm416_vm0, %v2635_v30 }
 0x7d9   : > { %5615 = vmatprep.mubr.msk.bf16.mxu0 %vm5996_vm1, %v5995_v7  ;;  %5612 = vmatpush3.bf16.msra.mxu0 %v5835_v2 }
 0x7da   : > { %5613 = vmatprep.subr.bf16.mxu0 %v5995_v7 }
 0x7dd   : > { %5614 = vmatpush3.bf16.msra.mxu0 %v5836_v13 }
 0x7de   : > { %5619 = vmatprep.subr.bf16.mxu0 %v5995_v7 }
 0x8ab   : > { %v2689_v31 = vpop.f32.mrb[32].mxu0 }
 0x8ac   : > { %v5597_v47 = vpop.f32.mrb[33].mxu0  ;;  %v2696_v51 = vmax.f32 %v2689_v31, 0.0 }
 0x8ad   : > { %v2692_v33 = vpop.f32.mrb[34].mxu0 }
 0x8ae   : > { %v2697_v41 = vmax.f32 %v2692_v33, 0.0  ;;  %v5598_v18 = vpop.f32.mrb[35].mxu0 }
 0x8b0   : > { %v2698_v42 = vpack.c.bf16 %v2697_v41, %v2696_v51 }
 0x8b2   : > { %5608 = vmatmul.mubr.msk.bf16.vlgmr.msra.gmra.mrb[40].mxu1 %vm2731_vm6, %v2698_v42 }
 0x8b3   : > { %5627 = vmatprep.mubr.msk.bf16.mxu1 %vm5996_vm1, %v5995_v7 }
 0x985   : > { %v2769_v39 = vpop.f32.mrb[40].mxu1 }
 0x986   : > { %v6631_v40 = vadd.f32 %v2769_v39, %v2608_v52  ;;  %v5609_v44 = vpop.f32.mrb[41].mxu1 }
 0x987   : > { %v2772_v45 = vpop.f32.mrb[42].mxu1 }
 0x988   : > { %v6633_v11 = vadd.f32 %v2772_v45, %v2609_v32  ;;  %v5610_v35 = vpop.f32.mrb[43].mxu1  ;;  %v2780_v61 = vmul.f32 %v6631_v40, %v6631_v40 }
 0x98a   : > { %v2782_v46 = vsel %vm416_vm0, %v2780_v61, 0.0  ;;  %v2781_v53 = vmul.f32 %v6633_v11, %v6633_v11 }
 0x98b   : > { %2783 = vadd.xlane.f32.xlu0 %v2782_v46 }
 0x98c   : > { %v2785_v57 = vsel %vm416_vm0, %v2781_v53, 0.0 }
 0x98f   : > { %2786 = vadd.xlane.f32.xlu0 %v2785_v57 }
 0xa18   : > { %v2784_v54 = vpop.xlane.xlu0 %2783 }
 0xa19   : > { %v2788_v25 = vmul.f32 0.03125, %v2784_v54 }
 0xa1b   : > { %v2790_v27 = vadd.f32 1e-06, %v2788_v25 }
 0xa1c   : > { %v2787_v59 = vpop.xlane.xlu0 %2786 }
 0xa1d   : > { %5885 = vrsqrt.f32 %v2790_v27  ;;  %v2789_v52 = vmul.f32 0.03125, %v2787_v59 }
 0xa1f   : > { %v2791_v56 = vadd.f32 1e-06, %v2789_v52 }
 0xa21   : > { %5887 = vrsqrt.f32 %v2791_v56 }
 0xa27   : > { %v5886_v5 = vpop.eup %5885 }
 0xa28   : > { %v2794_v58 = vmul.f32 %v5886_v5, %v6631_v40 }
 0xa2a   : > { %v2802_v63 = vmul.f32 %v5311_v60, %v2794_v58 }
 0xa2b   : > { %v5888_v32 = vpop.eup %5887 }
 0xa2c   : > { %v2795_v62 = vmul.f32 %v5888_v32, %v6633_v11 }
 0xa2e   : > { %v2803_v0 = vmul.f32 %v5311_v60, %v2795_v62 }
 0xa30   : > { %v2804_v1 = vpack.c.bf16 %v2803_v0, %v2802_v63 }
 0xa32   : > { %5616 = vmatmul.mubr.msk.bf16.vlgmr.msra.gmra.mrb[36].mxu0 %vm416_vm0, %v2804_v1 }
 0xa33   : > { %5621 = vmatprep.mubr.msk.bf16.mxu0 %vm5996_vm1, %v5995_v7 }
 0xb05   : > { %v2859_v3 = vpop.f32.mrb[36].mxu0 }
 0xb06   : > { %2874 = vrot.lane.b32.xlu0 %v2859_v3, %s5999_s28  ;;  %2868 = vrot.lane.b32.xlu1 %v2859_v3, %s7191_s18  ;;  %v5617_v4 = vpop.f32.mrb[37].mxu0 }
 0xb07   : > { %v6659_v6 = vpop.f32.mrb[38].mxu0 }
 0xb08   : > { %v5618_v8 = vpop.f32.mrb[39].mxu0 }
 0xb0a   : > { %2880 = vrot.lane.b32.xlu1 %v2859_v3, %s7192_s20  ;;  %2876 = vrot.lane.b32.xlu0 %v6659_v6, %s5999_s28 }
 0xb0e   : > { %3166 = vrot.lane.b32.xlu0 %v2859_v3, %s7193_s29  ;;  %2870 = vrot.lane.b32.xlu1 %v6659_v6, %s7191_s18 }
 0xb12   : > { %2882 = vrot.lane.b32.xlu1 %v6659_v6, %s7192_s20  ;;  %s7121_s20 = scalar_lea.hbm %s7179_s10, %s5386_s30 }
 0xb78   : > { %v6669_v9 = vpop.permute.xlu0 %2874  ;;  %v6671_v26 = vpop.permute.xlu1 %2868 }
 0xb79   : > { %3174 = vrot.lane.b32.xlu0 %v6669_v9, %s7193_s29  ;;  %3170 = vrot.lane.b32.xlu1 %v6671_v26, %s7193_s29  ;;  %v2886_v38 = vcombine.low %v2859_v3, %v6669_v9  ;;  %v2887_v34 = vcombine.high %v2859_v3, %v6669_v9 }
 0xb7b   : > { %v2894_v29 = vrot.slane %v2886_v38, %v6168_v37  ;;  %v2901_v30 = vrot.slane %v2887_v34, %v6168_v37 }
 0xb7c   : > { %v6677_v23 = vpop.permute.xlu1 %2880  ;;  %v6683_v10 = vpop.permute.xlu0 %2876 }
 0xb7d   : > { %3168 = vrot.lane.b32.xlu0 %v6659_v6, %s7193_s29  ;;  %3178 = vrot.lane.b32.xlu1 %v6677_v23, %s7193_s29  ;;  %v2902_v20 = vcombine.low %v6671_v26, %v6677_v23  ;;  %v2903_v15 = vcombine.high %v6671_v26, %v6677_v23  ;;  %v2954_v53 = vcombine.low %v6659_v6, %v6683_v10 }
 0xb7e   : > { %v2955_v57 = vcombine.high %v6659_v6, %v6683_v10 }
 0xb7f   : > { %v2910_v48 = vrot.slane %v2902_v20, %v6168_v37  ;;  %v2917_v28 = vrot.slane %v2903_v15, %v6168_v37  ;;  %v2962_v62 = vrot.slane %v2954_v53, %v6168_v37 }
 0xb80   : > { %v6685_v19 = vpop.permute.xlu1 %2870  ;;  %v3167_v33 = vpop.permute.xlu0 %3166  ;;  %v6732_v63 = vrot.slane %v2955_v57, %v6168_v37 }
 0xb81   : > { %3176 = vrot.lane.b32.xlu0 %v6683_v10, %s7193_s29  ;;  %3172 = vrot.lane.b32.xlu1 %v6685_v19, %s7193_s29  ;;  %v2918_v14 = vcombine.low %v2894_v29, %v2910_v48  ;;  %v2919_v24 = vcombine.high %v2894_v29, %v2910_v48  ;;  %v2934_v31 = vcombine.low %v2901_v30, %v2917_v28 }
 0xb82   : > { %v2935_v47 = vcombine.high %v2901_v30, %v2917_v28 }
 0xb83   : > { %v2926_v51 = vrot.slane %v2918_v14, %v6174_v43  ;;  %v2933_v41 = vrot.slane %v2919_v24, %v6174_v43  ;;  %v2942_v18 = vrot.slane %v2934_v31, %v6174_v43 }
 0xb84   : > { %v6691_v21 = vpop.permute.xlu1 %2882  ;;  %v2949_v42 = vrot.slane %v2935_v47, %v6174_v43 }
 0xb85   : > { %3180 = vrot.lane.b32.xlu1 %v6691_v21, %s7193_s29  ;;  %v3022_v45 = vcombine.low %v2926_v51, %v2933_v41  ;;  %v5319_v35 = vcombine.high %v2926_v51, %v2933_v41  ;;  %v2970_v2 = vcombine.low %v6685_v19, %v6691_v21  ;;  %v2971_v13 = vcombine.high %v6685_v19, %v6691_v21  ;;  %s365_s29 = sand.u32 1, %s5985_s14  }
 0xb86   : > { %v3038_v61 = vcombine.low %v2942_v18, %v2949_v42  ;;  %v5320_v46 = vcombine.high %v2942_v18, %v2949_v42  ;;  %s5258_s28 = sshll.u32 %s365_s29, 4  ;;  %s7127_s17 = scalar_lea.sflag [#allocation3], %s365_s29 }
 0xb87   : > { %v6719_v59 = vrot.slane %v3022_v45, %v6168_v37  ;;  %v6722_v52 = vrot.slane %v5319_v35, %v6168_v37  ;;  %v2978_v0 = vrot.slane %v2970_v2, %v6168_v37  ;;  %v2985_v1 = vrot.slane %v2971_v13, %v6168_v37 }
 0xb88   : > { %v6725_v56 = vrot.slane %v3038_v61, %v6168_v37  ;;  %v6728_v5 = vrot.slane %v5320_v46, %v6168_v37 }
 0xb89   : > { %3470 = vrot.lane.b32.xlu1 %v2859_v3, %s6003_s11  ;;  %v3054_v38 = vcombine.low %v6719_v59, %v6722_v52  ;;  %v3055_v48 = vcombine.high %v6719_v59, %v6722_v52  ;;  %v2986_v47 = vcombine.low %v2962_v62, %v2978_v0  ;;  %v3002_v51 = vcombine.low %v6732_v63, %v2985_v1 }
 0xb8a   : > { %v3070_v34 = vcombine.low %v6725_v56, %v6728_v5  ;;  %v3071_v28 = vcombine.high %v6725_v56, %v6728_v5  ;;  %v3003_v41 = vcombine.high %v6732_v63, %v2985_v1 }
 0xb8b   : > { %v3062_v46 = vrot.slane %v3054_v38, %v6174_v43 }
 0xb8c   : > { %v3078_v53 = vrot.slane %v3070_v34, %v6174_v43 }
 0xbeb   : > { %v3175_v39 = vpop.permute.xlu0 %3174  ;;  %v3171_v44 = vpop.permute.xlu1 %3170 }
 0xbec   : > { %v3190_v54 = vcombine.low %v3167_v33, %v3175_v39  ;;  %v3191_v25 = vcombine.high %v3167_v33, %v3175_v39  ;;  %v2987_v33 = vcombine.high %v2962_v62, %v2978_v0 }
 0xbee   : > { %v3198_v3 = vrot.slane %v3190_v54, %v6168_v37  ;;  %v3205_v4 = vrot.slane %v3191_v25, %v6168_v37  ;;  %v6757_v25 = vrot.slane %v2986_v47, %v6174_v43 }
 0xbef   : > { %v3169_v27 = vpop.permute.xlu0 %3168  ;;  %v3179_v58 = vpop.permute.xlu1 %3178 }
 0xbf0   : > { %v3206_v32 = vcombine.low %v3171_v44, %v3179_v58  ;;  %v3207_v60 = vcombine.high %v3171_v44, %v3179_v58  ;;  %v6760_v58 = vrot.slane %v2987_v33, %v6174_v43 }
 0xbf2   : > { %v3214_v8 = vrot.slane %v3206_v32, %v6168_v37  ;;  %v3221_v20 = vrot.slane %v3207_v60, %v6168_v37 }
 0xbf3   : > { %v3173_v15 = vpop.permute.xlu1 %3172  ;;  %v3177_v31 = vpop.permute.xlu0 %3176 }
 0xbf4   : > { %v3222_v29 = vcombine.low %v3198_v3, %v3214_v8  ;;  %v3223_v30 = vcombine.high %v3198_v3, %v3214_v8  ;;  %v3238_v14 = vcombine.low %v3205_v4, %v3221_v20  ;;  %v3239_v24 = vcombine.high %v3205_v4, %v3221_v20 }
 0xbf5   : > { %v3258_v45 = vcombine.low %v3169_v27, %v3177_v31  ;;  %v3259_v35 = vcombine.high %v3169_v27, %v3177_v31 }
 0xbf6   : > { %v3230_v18 = vrot.slane %v3222_v29, %v6174_v43  ;;  %v3237_v42 = vrot.slane %v3223_v30, %v6174_v43  ;;  %v3246_v39 = vrot.slane %v3238_v14, %v6174_v43  ;;  %v3253_v44 = vrot.slane %v3239_v24, %v6174_v43 }
 0xbf7   : > { %v3181_v61 = vpop.permute.xlu1 %3180  ;;  %v3266_v1 = vrot.slane %v3258_v45, %v6168_v37  ;;  %v3273_v3 = vrot.slane %v3259_v35, %v6168_v37  ;;  %v3010_v35 = vrot.slane %v3002_v51, %v6174_v43 }
 0xbf8   : > { %v3326_v57 = vcombine.low %v3230_v18, %v3237_v42  ;;  %v5323_v2 = vcombine.high %v3230_v18, %v3237_v42  ;;  %v3342_v13 = vcombine.low %v3246_v39, %v3253_v44  ;;  %v5324_v54 = vcombine.high %v3246_v39, %v3253_v44 }
 0xbf9   : > { %v3274_v32 = vcombine.low %v3173_v15, %v3181_v61  ;;  %v3275_v60 = vcombine.high %v3173_v15, %v3181_v61  ;;  %v3017_v61 = vrot.slane %v3003_v41, %v6174_v43 }
 0xbfa   : > { %v3333_v62 = vrot.slane %v3326_v57, %v6168_v37  ;;  %v3341_v27 = vrot.slane %v5323_v2, %v6168_v37  ;;  %v3349_v63 = vrot.slane %v3342_v13, %v6168_v37  ;;  %v3357_v0 = vrot.slane %v5324_v54, %v6168_v37 }
 0xbfb   : > { %v3282_v4 = vrot.slane %v3274_v32, %v6168_v37  ;;  %v3289_v8 = vrot.slane %v3275_v60, %v6168_v37 }
 0xbfc   : > { %v3358_v20 = vcombine.low %v3333_v62, %v3341_v27  ;;  %v3374_v38 = vcombine.low %v3349_v63, %v3357_v0  ;;  %v3359_v34 = vcombine.high %v3333_v62, %v3341_v27  ;;  %v3375_v15 = vcombine.high %v3349_v63, %v3357_v0 }
 0xbfd   : > { %v3290_v29 = vcombine.low %v3266_v1, %v3282_v4  ;;  %v3291_v30 = vcombine.high %v3266_v1, %v3282_v4  ;;  %v3306_v14 = vcombine.low %v3273_v3, %v3289_v8  ;;  %v3307_v24 = vcombine.high %v3273_v3, %v3289_v8 }
 0xbfe   : > { %v3366_v31 = vrot.slane %v3358_v20, %v6174_v43  ;;  %v3382_v47 = vrot.slane %v3374_v38, %v6174_v43  ;;  %v3373_v33 = vrot.slane %v3359_v34, %v6174_v43  ;;  %v3389_v18 = vrot.slane %v3375_v15, %v6174_v43 }
 0xbff   : > { %v3298_v42 = vrot.slane %v3290_v29, %v6174_v43  ;;  %v3305_v39 = vrot.slane %v3291_v30, %v6174_v43  ;;  %v3314_v44 = vrot.slane %v3306_v14, %v6174_v43  ;;  %v3321_v45 = vrot.slane %v3307_v24, %v6174_v43 }
 0xc00   : > { %v3390_v57 = vcombine.low %v3366_v31, %v3382_v47  ;;  %v3391_v2 = vcombine.high %v3366_v31, %v3382_v47  ;;  %v3086_v63 = vcombine.low %v3062_v46, %v3078_v53  ;;  %v3392_v0 = vcombine.low %v3373_v33, %v3389_v18 }
 0xc01   : > { %v3394_v13 = vcombine.low %v3298_v42, %v3305_v39  ;;  %v5325_v54 = vcombine.high %v3298_v42, %v3305_v39  ;;  %v3410_v32 = vcombine.low %v3314_v44, %v3321_v45  ;;  %v5326_v60 = vcombine.high %v3314_v44, %v3321_v45 }
 0xc02   : > { %v3462_v62 = vpack.c.bf16 %v3390_v57, %v3390_v57  ;;  %v3463_v27 = vpack.c.bf16 %v3391_v2, %v3391_v2  ;;  %v3087_v20 = vcombine.high %v3062_v46, %v3078_v53  ;;  %v3393_v38 = vcombine.high %v3373_v33, %v3389_v18 }
 0xc03   : > { %v3401_v1 = vrot.slane %v3394_v13, %v6168_v37  ;;  %v3409_v3 = vrot.slane %v5325_v54, %v6168_v37  ;;  %v3417_v4 = vrot.slane %v3410_v32, %v6168_v37  ;;  %v3425_v51 = vrot.slane %v5326_v60, %v6168_v37 }
 0xc04   : > { %v3778_v41 = vsel %vm1409_vm2, %v3462_v62, 0  ;;  %v3824_v8 = vsel %vm1409_vm2, %v3463_v27, 0  ;;  %v3090_v34 = vcombine.low %v6757_v25, %v6760_v58  ;;  %v5321_v30 = vcombine.high %v6757_v25, %v6760_v58 }
 0xc05   : > { %5620 = vmatpush3.bf16.xpose.msra.mxu0 %v3778_v41  ;;  %5626 = vmatpush3.bf16.xpose.msra.mxu1 %v3824_v8  ;;  %v3426_v15 = vcombine.low %v3401_v1, %v3409_v3  ;;  %v3442_v29 = vcombine.low %v3417_v4, %v3425_v51  ;;  %v3106_v14 = vcombine.low %v3010_v35, %v3017_v61 }
 0xc06   : > { %v5322_v24 = vcombine.high %v3010_v35, %v3017_v61  ;;  %5631 = vmatprep.subr.bf16.mxu0 %v5995_v7  ;;  %5637 = vmatprep.subr.bf16.mxu1 %v5995_v7  ;;  %v3464_v31 = vpack.c.bf16 %v3392_v0, %v3392_v0  ;;  %v3465_v47 = vpack.c.bf16 %v3393_v38, %v3393_v38 }
 0xc07   : > { %v3434_v46 = vrot.slane %v3426_v15, %v6174_v43  ;;  %v3450_v53 = vrot.slane %v3442_v29, %v6174_v43  ;;  %v3158_v33 = vpack.c.bf16 %v3086_v63, %v3086_v63  ;;  %v3159_v18 = vpack.c.bf16 %v3087_v20, %v3087_v20 }
 0xc08   : > { %v3069_v42 = vrot.slane %v3055_v48, %v6174_v43  ;;  %v3085_v25 = vrot.slane %v3071_v28, %v6174_v43  ;;  %v3097_v58 = vrot.slane %v3090_v34, %v6168_v37  ;;  %v3105_v39 = vrot.slane %v5321_v30, %v6168_v37 }
 0xc09   : > { %v3113_v44 = vrot.slane %v3106_v14, %v6168_v37  ;;  %v3121_v45 = vrot.slane %v5322_v24, %v6168_v37  ;;  %v3870_v35 = vsel %vm1409_vm2, %v3464_v31, 0  ;;  %v3427_v61 = vcombine.high %v3401_v1, %v3409_v3 }
 0xc0a   : > { %v3916_v59 = vsel %vm1409_vm2, %v3465_v47, 0  ;;  %v3458_v52 = vcombine.low %v3434_v46, %v3450_v53  ;;  %v3459_v56 = vcombine.high %v3434_v46, %v3450_v53  ;;  %v3443_v5 = vcombine.high %v3417_v4, %v3425_v51 }
 0xc0b   : > { %v3088_v48 = vcombine.low %v3069_v42, %v3085_v25  ;;  %v3089_v28 = vcombine.high %v3069_v42, %v3085_v25  ;;  %v3122_v57 = vcombine.low %v3097_v58, %v3105_v39  ;;  %v3138_v2 = vcombine.low %v3113_v44, %v3121_v45 }
 0xc0c   : > { %5622 = vmatmul.mubr.msk.bf16.vlgmr.msra.gmra.mrb[40].mxu0 %vm1409_vm2, %v3158_v33  ;;  %5628 = vmatmul.mubr.msk.bf16.vlgmr.msra.gmra.mrb[44].mxu1 %vm1409_vm2, %v3159_v18  ;;  %v3466_v13 = vpack.c.bf16 %v3458_v52, %v3458_v52  ;;  %v3467_v54 = vpack.c.bf16 %v3459_v56, %v3459_v56  ;;  %v3441_v32 = vrot.slane %v3427_v61, %v6174_v43 }
 0xc0d   : > { %5632 = vmatpush3.bf16.xpose.msra.mxu0 %v3870_v35  ;;  %5638 = vmatpush3.bf16.xpose.msra.mxu1 %v3916_v59  ;;  %v3457_v60 = vrot.slane %v3443_v5, %v6174_v43  ;;  %v3160_v62 = vpack.c.bf16 %v3088_v48, %v3088_v48  ;;  %v3161_v27 = vpack.c.bf16 %v3089_v28, %v3089_v28 }
 0xc0e   : > { %5633 = vmatprep.mubr.msk.bf16.mxu0 %vm5996_vm1, %v5995_v7  ;;  %5639 = vmatprep.mubr.msk.bf16.mxu1 %vm5996_vm1, %v5995_v7  ;;  %v3130_v63 = vrot.slane %v3122_v57, %v6174_v43  ;;  %v3146_v0 = vrot.slane %v3138_v2, %v6174_v43  ;;  %v3962_v1 = vsel %vm1409_vm2, %v3466_v13, 0  ;;  %v4008_v3 = vsel %vm1409_vm2, %v3467_v54, 0 }
 0xc0f   : > { %5643 = vmatprep.subr.bf16.mxu0 %v5995_v7  ;;  %5649 = vmatprep.subr.bf16.mxu1 %v5995_v7  ;;  %v3460_v4 = vcombine.low %v3441_v32, %v3457_v60  ;;  %v3461_v51 = vcombine.high %v3441_v32, %v3457_v60  ;;  %v3123_v41 = vcombine.high %v3097_v58, %v3105_v39 }
 0xc10   : > { %v3154_v8 = vcombine.low %v3130_v63, %v3146_v0  ;;  %v3155_v20 = vcombine.high %v3130_v63, %v3146_v0  ;;  %v3139_v38 = vcombine.high %v3113_v44, %v3121_v45 }
 0xc11   : > { %v3468_v34 = vpack.c.bf16 %v3460_v4, %v3460_v4  ;;  %v3469_v15 = vpack.c.bf16 %v3461_v51, %v3461_v51  ;;  %v3137_v14 = vrot.slane %v3123_v41, %v6174_v43 }
 0xc12   : > { %v3162_v29 = vpack.c.bf16 %v3154_v8, %v3154_v8  ;;  %v3163_v30 = vpack.c.bf16 %v3155_v20, %v3155_v20  ;;  %v3153_v24 = vrot.slane %v3139_v38, %v6174_v43 }
 0xc13   : > { %v4054_v31 = vsel %vm1409_vm2, %v3468_v34, 0  ;;  %v4100_v47 = vsel %vm1409_vm2, %v3469_v15, 0 }
 0xc14   : > { %5634 = vmatmul.mubr.msk.bf16.vlgmr.msra.gmra.mrb[44].mxu0 %vm1409_vm2, %v3160_v62  ;;  %5640 = vmatmul.mubr.msk.bf16.vlgmr.msra.gmra.mrb[48].mxu1 %vm1409_vm2, %v3161_v27  ;;  %v3156_v46 = vcombine.low %v3137_v14, %v3153_v24  ;;  %v3157_v53 = vcombine.high %v3137_v14, %v3153_v24 }
 0xc15   : > { %5644 = vmatpush3.bf16.xpose.msra.mxu0 %v3962_v1  ;;  %5650 = vmatpush3.bf16.xpose.msra.mxu1 %v4008_v3 }
 0xc16   : > { %5645 = vmatprep.mubr.msk.bf16.mxu0 %vm5996_vm1, %v5995_v7  ;;  %5651 = vmatprep.mubr.msk.bf16.mxu1 %vm5996_vm1, %v5995_v7  ;;  %v3164_v33 = vpack.c.bf16 %v3156_v46, %v3156_v46  ;;  %v3165_v18 = vpack.c.bf16 %v3157_v53, %v3157_v53 }
 0xc17   : > { %5655 = vmatprep.subr.bf16.mxu0 %v5995_v7  ;;  %5661 = vmatprep.subr.bf16.mxu1 %v5995_v7 }
 0xc1c   : > { %5646 = vmatmul.mubr.msk.bf16.vlgmr.msra.gmra.mrb[48].mxu0 %vm1409_vm2, %v3162_v29  ;;  %5652 = vmatmul.mubr.msk.bf16.vlgmr.msra.gmra.mrb[52].mxu1 %vm1409_vm2, %v3163_v30 }
 0xc1d   : > { %5656 = vmatpush3.bf16.xpose.msra.mxu0 %v4054_v31  ;;  %5662 = vmatpush3.bf16.xpose.msra.mxu1 %v4100_v47 }
 0xc1e   : > { %5657 = vmatprep.mubr.msk.bf16.mxu0 %vm5996_vm1, %v5995_v7  ;;  %5663 = vmatprep.mubr.msk.bf16.mxu1 %vm5996_vm1, %v5995_v7 }
 0xc1f   : > { %5667 = vmatprep.subr.bf16.mxu0 %v5995_v7  ;;  %5673 = vmatprep.subr.bf16.mxu1 %v5995_v7 }
 0xc24   : > { %5658 = vmatmul.mubr.msk.bf16.vlgmr.msra.gmra.mrb[52].mxu0 %vm1409_vm2, %v3164_v33  ;;  %5664 = vmatmul.mubr.msk.bf16.vlgmr.msra.gmra.mrb[56].mxu1 %vm1409_vm2, %v3165_v18 }
 0xc25   : > { %5669 = vmatprep.mubr.msk.bf16.mxu0 %vm5996_vm1, %v5995_v7  ;;  %5675 = vmatprep.mubr.msk.bf16.mxu1 %vm5996_vm1, %v5995_v7 }
 0xcdf   : > { %v3814_v42 = vpop.f32.mrb[40].mxu0  ;;  %v3860_v25 = vpop.f32.mrb[44].mxu1 }
 0xce0   : > { %v6849_v58 = vadd.f32 %v3814_v42, %v6385_v55  ;;  %v6852_v39 = vadd.f32 %v3860_v25, %v6387_v12  ;;  %v5623_v44 = vpop.f32.mrb[41].mxu0  ;;  %v5629_v45 = vpop.f32.mrb[45].mxu1 }
 0xce1   : > { %v3817_v35 = vpop.f32.mrb[42].mxu0  ;;  %v3863_v61 = vpop.f32.mrb[46].mxu1 }
 0xce2   : > { %v5624_v59 = vpop.f32.mrb[43].mxu0  ;;  %v5630_v52 = vpop.f32.mrb[47].mxu1  ;;  %v4142_v56 = vsel %vm1409_vm2, %v6849_v58, -inf  ;;  %v4145_v5 = vsel %vm1409_vm2, %v6852_v39, -inf }
 0xce3   : > { %4143 = vmax.xlane.f32.xlu0 %v4142_v56  ;;  %4146 = vmax.xlane.f32.xlu1 %v4145_v5 }
 0xce7   : > { %v3906_v48 = vpop.f32.mrb[44].mxu0  ;;  %v3952_v55 = vpop.f32.mrb[48].mxu1 }
 0xce8   : > { %v3907_v28 = vadd.f32 %v3906_v48, %v6405_v16  ;;  %v5635_v12 = vpop.f32.mrb[45].mxu0  ;;  %v5641_v57 = vpop.f32.mrb[49].mxu1  ;;  %v3953_v54 = vadd.f32 %v3952_v55, %v6407_v17 }
 0xce9   : > { %v3909_v2 = vpop.f32.mrb[46].mxu0  ;;  %v3955_v13 = vpop.f32.mrb[50].mxu1 }
 0xcea   : > { %v5636_v32 = vpop.f32.mrb[47].mxu0  ;;  %v5642_v60 = vpop.f32.mrb[51].mxu1  ;;  %v4148_v62 = vsel %vm1409_vm2, %v3907_v28, -inf  ;;  %v4151_v27 = vsel %vm1409_vm2, %v3953_v54, -inf }
 0xceb   : > { %4149 = vmax.xlane.f32.xlu0 %v4148_v62 }
 0xcef   : > { %v3998_v63 = vpop.f32.mrb[48].mxu0  ;;  %4152 = vmax.xlane.f32.xlu0 %v4151_v27  ;;  %v4044_v0 = vpop.f32.mrb[52].mxu1 }
 0xcf0   : > { %v3999_v1 = vadd.f32 %v3998_v63, %v6413_v36  ;;  %v4045_v16 = vadd.f32 %v4044_v0, %v6415_v22  ;;  %v5647_v3 = vpop.f32.mrb[49].mxu0  ;;  %v5653_v4 = vpop.f32.mrb[53].mxu1 }
 0xcf1   : > { %v4001_v51 = vpop.f32.mrb[50].mxu0  ;;  %v4047_v41 = vpop.f32.mrb[54].mxu1 }
 0xcf2   : > { %v5648_v8 = vpop.f32.mrb[51].mxu0  ;;  %v5654_v17 = vpop.f32.mrb[55].mxu1  ;;  %v4154_v20 = vsel %vm1409_vm2, %v3999_v1, -inf  ;;  %v4157_v38 = vsel %vm1409_vm2, %v4045_v16, -inf }
 0xcf3   : > { %4155 = vmax.xlane.f32.xlu1 %v4154_v20  ;;  %4158 = vmax.xlane.f32.xlu0 %v4157_v38 }
 0xcf7   : > { %v4090_v34 = vpop.f32.mrb[52].mxu0  ;;  %v4136_v15 = vpop.f32.mrb[56].mxu1 }
 0xcf8   : > { %v6867_v29 = vadd.f32 %v4090_v34, %v6421_v49  ;;  %v6870_v36 = vadd.f32 %v4136_v15, %v6423_v50  ;;  %v5659_v22 = vpop.f32.mrb[53].mxu0  ;;  %v5665_v30 = vpop.f32.mrb[57].mxu1 }
 0xcf9   : > { %v4093_v14 = vpop.f32.mrb[54].mxu0  ;;  %v4139_v24 = vpop.f32.mrb[58].mxu1 }
 0xcfa   : > { %v5660_v31 = vpop.f32.mrb[55].mxu0  ;;  %v5666_v47 = vpop.f32.mrb[59].mxu1  ;;  %v4160_v46 = vsel %vm1409_vm2, %v6867_v29, -inf  ;;  %v4163_v53 = vsel %vm1409_vm2, %v6870_v36, -inf }
 0xcfb   : > { %4161 = vmax.xlane.f32.xlu1 %v4160_v46  ;;  %4164 = vmax.xlane.f32.xlu0 %v4163_v53  ;;  %v3471_v49 = vpop.permute.xlu1 %3470 }
 0xd0c   : > { %3478 = vrot.lane.b32.xlu1 %v6669_v9, %s6003_s11 }
 0xd10   : > { %3482 = vrot.lane.b32.xlu1 %v6677_v23, %s6003_s11 }
 0xd11   : > { %3474 = vrot.lane.b32.xlu0 %v6671_v26, %s6003_s11 }
 0xd14   : > { %3472 = vrot.lane.b32.xlu1 %v6659_v6, %s6003_s11 }
 0xd70   : > { %v4144_v50 = vpop.xlane.xlu0 %4143  ;;  %v4147_v33 = vpop.xlane.xlu1 %4146 }
 0xd71   : > { %v4166_v18 = vsub.f32 %v6849_v58, %v4144_v50  ;;  %v4167_v42 = vsub.f32 %v6852_v39, %v4147_v33 }
 0xd73   : > { %v4174_v25 = vmul.f32 1.442695, %v4166_v18  ;;  %v4176_v44 = vmul.f32 1.442695, %v4167_v42 }
 0xd75   : > { %5889 = vpow2.f32 %v4174_v25 }
 0xd76   : > { %5891 = vpow2.f32 %v4176_v44 }
 0xd78   : > { %v4150_v9 = vpop.xlane.xlu0 %4149 }
 0xd79   : > { %v4168_v45 = vsub.f32 %v3907_v28, %v4150_v9 }
 0xd7b   : > { %v4178_v23 = vmul.f32 1.442695, %v4168_v45 }
 0xd7c   : > { %v4153_v35 = vpop.xlane.xlu0 %4152 }
 0xd7d   : > { %5893 = vpow2.f32 %v4178_v23  ;;  %v4169_v26 = vsub.f32 %v3953_v54, %v4153_v35 }
 0xd7f   : > { %v6886_v61 = vpop.eup %5889  ;;  %v4180_v6 = vmul.f32 1.442695, %v4169_v26 }
 0xd80   : > { %v6888_v59 = vpop.eup %5891  ;;  %v4156_v52 = vpop.xlane.xlu1 %4155  ;;  %v4190_v58 = vsel %vm1409_vm2, %v6886_v61, 0.0 }
 0xd81   : > { %v4159_v56 = vpop.xlane.xlu0 %4158  ;;  %5895 = vpow2.f32 %v4180_v6  ;;  %v4170_v39 = vsub.f32 %v3999_v1, %v4156_v52  ;;  %4191 = vadd.xlane.f32.xlu1 %v4190_v58  ;;  %v4193_v48 = vsel %vm1409_vm2, %v6888_v59, 0.0 }
 0xd82   : > { %v4171_v5 = vsub.f32 %v4045_v16, %v4159_v56  ;;  %4194 = vadd.xlane.f32.xlu0 %v4193_v48 }
 0xd83   : > { %v4182_v55 = vmul.f32 1.442695, %v4170_v39 }
 0xd84   : > { %v4184_v28 = vmul.f32 1.442695, %v4171_v5 }
 0xd85   : > { %5897 = vpow2.f32 %v4182_v55 }
 0xd86   : > { %5899 = vpow2.f32 %v4184_v28 }
 0xd87   : > { %v6894_v12 = vpop.eup %5893 }
 0xd88   : > { %v6896_v57 = vpop.xlane.xlu1 %4161  ;;  %v4196_v2 = vsel %vm1409_vm2, %v6894_v12, 0.0  ;;  %v4165_v13 = vpop.xlane.xlu0 %4164 }
 0xd89   : > { %4197 = vadd.xlane.f32.xlu0 %v4196_v2  ;;  %v4173_v2 = vsub.f32 %v6870_v36, %v4165_v13 }
 0xd8b   : > { %v6900_v54 = vpop.eup %5895 }
 0xd8c   : > { %v3479_v32 = vpop.permute.xlu1 %3478  ;;  %v4199_v60 = vsel %vm1409_vm2, %v6900_v54, 0.0  ;;  %v3475_v0 = vpop.permute.xlu0 %3474 }
 0xd8d   : > { %4200 = vadd.xlane.f32.xlu1 %v4199_v60  ;;  %v3494_v27 = vcombine.low %v3471_v49, %v3479_v32  ;;  %v3495_v63 = vcombine.high %v3471_v49, %v3479_v32  ;;  %v4188_v32 = vmul.f32 1.442695, %v4173_v2 }
 0xd8f   : > { %v6904_v62 = vpop.eup %5897  ;;  %v3502_v41 = vrot.slane %v3494_v27, %v6168_v37  ;;  %v3509_v8 = vrot.slane %v3495_v63, %v6168_v37  ;;  %5901 = vpow2.f32 %v4188_v32 }
 0xd90   : > { %v3483_v1 = vpop.permute.xlu1 %3482  ;;  %v4202_v16 = vsel %vm1409_vm2, %v6904_v62, 0.0  ;;  %v6908_v3 = vpop.eup %5899 }
 0xd91   : > { %v3510_v4 = vcombine.low %v3475_v0, %v3483_v1  ;;  %v3511_v51 = vcombine.high %v3475_v0, %v3483_v1  ;;  %4203 = vadd.xlane.f32.xlu0 %v4202_v16  ;;  %v4205_v38 = vsel %vm1409_vm2, %v6908_v3, 0.0 }
 0xd93   : > { %v3518_v17 = vrot.slane %v3510_v4, %v6168_v37  ;;  %v3525_v20 = vrot.slane %v3511_v51, %v6168_v37 }
 0xd94   : > { %v3473_v36 = vpop.permute.xlu1 %3472 }
 0xd95   : > { %v3526_v34 = vcombine.low %v3502_v41, %v3518_v17  ;;  %v3527_v15 = vcombine.high %v3502_v41, %v3518_v17  ;;  %v3542_v22 = vcombine.low %v3509_v8, %v3525_v20  ;;  %v3543_v30 = vcombine.high %v3509_v8, %v3525_v20  ;;  %4206 = vadd.xlane.f32.xlu0 %v4205_v38 }
 0xd97   : > { %v3534_v14 = vrot.slane %v3526_v34, %v6174_v43  ;;  %v3541_v24 = vrot.slane %v3527_v15, %v6174_v43  ;;  %v3550_v31 = vrot.slane %v3542_v22, %v6174_v43  ;;  %v3557_v47 = vrot.slane %v3543_v30, %v6174_v43 }
 0xd99   : > { %v3630_v46 = vcombine.low %v3534_v14, %v3541_v24  ;;  %v5327_v53 = vcombine.high %v3534_v14, %v3541_v24  ;;  %v3646_v49 = vcombine.low %v3550_v31, %v3557_v47  ;;  %v5328_v50 = vcombine.high %v3550_v31, %v3557_v47  ;;  %v6941_v27 = vpop.eup %5901 }
 0xd9a   : > { %v4211_v63 = vsel %vm1409_vm2, %v6941_v27, 0.0 }
 0xd9b   : > { %v3637_v33 = vrot.slane %v3630_v46, %v6168_v37  ;;  %v3645_v18 = vrot.slane %v5327_v53, %v6168_v37  ;;  %v3653_v42 = vrot.slane %v3646_v49, %v6168_v37  ;;  %v3661_v25 = vrot.slane %v5328_v50, %v6168_v37 }
 0xd9d   : > { %v3662_v44 = vcombine.low %v3637_v33, %v3645_v18  ;;  %v3678_v9 = vcombine.low %v3653_v42, %v3661_v25  ;;  %v3663_v45 = vcombine.high %v3637_v33, %v3645_v18  ;;  %v3679_v23 = vcombine.high %v3653_v42, %v3661_v25 }
 0xd9e   : > { %3480 = vrot.lane.b32.xlu1 %v6683_v10, %s6003_s11 }
 0xd9f   : > { %v3670_v35 = vrot.slane %v3662_v44, %v6174_v43  ;;  %v3686_v26 = vrot.slane %v3678_v9, %v6174_v43  ;;  %v3677_v6 = vrot.slane %v3663_v45, %v6174_v43  ;;  %v3693_v52 = vrot.slane %v3679_v23, %v6174_v43 }
 0xda1   : > { %v3694_v56 = vcombine.low %v3670_v35, %v3686_v26  ;;  %v3695_v58 = vcombine.high %v3670_v35, %v3686_v26  ;;  %v3696_v39 = vcombine.low %v3677_v6, %v3693_v52  ;;  %v3697_v5 = vcombine.high %v3677_v6, %v3693_v52 }
 0xda2   : > { %3484 = vrot.lane.b32.xlu1 %v6691_v21, %s6003_s11  ;;  %v4172_v21 = vsub.f32 %v6867_v29, %v6896_v57 }
 0xda3   : > { %v3766_v48 = vpack.c.bf16 %v3694_v56, %v3694_v56  ;;  %v3767_v55 = vpack.c.bf16 %v3695_v58, %v3695_v58  ;;  %v3768_v41 = vpack.c.bf16 %v3696_v39, %v3696_v39  ;;  %v3769_v17 = vpack.c.bf16 %v3697_v5, %v3697_v5 }
 0xda4   : > { %v4186_v60 = vmul.f32 1.442695, %v4172_v21 }
 0xda5   : > { %v4242_v28 = vsel %vm1877_vm3, %v3766_v48, 0  ;;  %v4288_v10 = vsel %vm1877_vm3, %v3767_v55, 0  ;;  %v4334_v34 = vsel %vm1877_vm3, %v3768_v41, 0  ;;  %v4380_v22 = vsel %vm1877_vm3, %v3769_v17, 0 }
 0xda6   : > { %5668 = vmatpush3.bf16.msra.mxu0 %v4242_v28  ;;  %5674 = vmatpush3.bf16.msra.mxu1 %v4288_v10  ;;  %5903 = vpow2.f32 %v4186_v60 }
 0xda7   : > { %5679 = vmatprep.subr.bf16.mxu0 %v5995_v7  ;;  %5685 = vmatprep.subr.bf16.mxu1 %v5995_v7 }
 0xdab   : > { %3476 = vrot.lane.b32.xlu0 %v6685_v19, %s6003_s11  ;;  %s6007_s11 = smov [#allocation2]  }
 0xdac   : > { %s5935_s21 = sshll.u32 %s6007_s11, 4  ;;  %s5936_s21 = int_to_ptr.vmem [resolvable:$false] %s5935_s21 }
 0xdad   : > { %s5937_s30 = scalar_lea.vmem %s5936_s21, 512 }
 0xdb0   : > { %v6945_v0 = vpop.eup %5903 }
 0xdb1   : > { %v4208_v19 = vsel %vm1409_vm2, %v6945_v0, 0.0 }
 0xdc6   : > { %4212 = vadd.xlane.f32.xlu1 %v4211_v63 }
 0xdca   : > { %4209 = vadd.xlane.f32.xlu0 %v4208_v19 }
 0xe0e   : > { %v4192_v13 = vpop.xlane.xlu1 %4191 }
 0xe0f   : > { %5905 = vrcp.f32 %v4192_v13  ;;  %v4195_v29 = vpop.xlane.xlu0 %4194 }
 0xe10   : > { %5907 = vrcp.f32 %v4195_v29 }
 0xe16   : > { %v4198_v57 = vpop.xlane.xlu0 %4197 }
 0xe17   : > { %5909 = vrcp.f32 %v4198_v57 }
 0xe19   : > { %v5906_v1 = vpop.eup %5905 }
 0xe1a   : > { %v5908_v16 = vpop.eup %5907  ;;  %v4222_v4 = vmul.f32 %v5906_v1, %v6886_v61  ;;  %v4201_v51 = vpop.xlane.xlu1 %4200 }
 0xe1b   : > { %v4223_v8 = vmul.f32 %v5908_v16, %v6888_v59  ;;  %5911 = vrcp.f32 %v4201_v51 }
 0xe1c   : > { %v4230_v20 = vpack.c.bf16 %v4222_v4, %v4222_v4 }
 0xe1d   : > { %v4231_v38 = vpack.c.bf16 %v4223_v8, %v4223_v8 }
 0xe1e   : > { %5670 = vmatmul.mubr.msk.bf16.vlgmr.msra.gmra.mrb[56].mxu0 %vm1409_vm2, %v4230_v20  ;;  %v4204_v15 = vpop.xlane.xlu0 %4203  ;;  %v3481_v30 = vpop.permute.xlu1 %3480 }
 0xe1f   : > { %5676 = vmatmul.mubr.msk.bf16.vlgmr.msra.gmra.mrb[60].mxu1 %vm1409_vm2, %v4231_v38  ;;  %5680 = vmatpush3.bf16.msra.mxu0 %v4334_v34  ;;  %v3562_v47 = vcombine.low %v3473_v36, %v3481_v30  ;;  %v3563_v46 = vcombine.high %v3473_v36, %v3481_v30  ;;  %5913 = vrcp.f32 %v4204_v15 }
 0xe20   : > { %5686 = vmatpush3.bf16.msra.mxu1 %v4380_v22  ;;  %5681 = vmatprep.mubr.msk.bf16.mxu0 %vm5996_vm1, %v5995_v7 }
 0xe21   : > { %v5910_v61 = vpop.eup %5909  ;;  %5687 = vmatprep.mubr.msk.bf16.mxu1 %vm5996_vm1, %v5995_v7  ;;  %5691 = vmatprep.subr.bf16.mxu0 %v5995_v7  ;;  %v3577_v25 = vrot.slane %v3563_v46, %v6168_v37 }
 0xe22   : > { %v4224_v59 = vmul.f32 %v5910_v61, %v6894_v12  ;;  %v4207_v14 = vpop.xlane.xlu0 %4206  ;;  %5697 = vmatprep.subr.bf16.mxu1 %v5995_v7  ;;  %v3485_v49 = vpop.permute.xlu1 %3484  ;;  %v3570_v12 = vrot.slane %v3562_v47, %v6168_v37 }
 0xe23   : > { %5915 = vrcp.f32 %v4207_v14 }
 0xe24   : > { %v4232_v24 = vpack.c.bf16 %v4224_v59, %v4224_v59 }
 0xe25   : > { %v5912_v31 = vpop.eup %5911 }
 0xe26   : > { %v4225_v53 = vmul.f32 %v5912_v31, %v6900_v54  ;;  %5682 = vmatmul.mubr.msk.bf16.vlgmr.msra.gmra.mrb[60].mxu0 %vm1409_vm2, %v4232_v24  ;;  %v3477_v50 = vpop.permute.xlu0 %3476 }
 0xe27   : > { %v3578_v33 = vcombine.low %v3477_v50, %v3485_v49  ;;  %v3579_v18 = vcombine.high %v3477_v50, %v3485_v49  ;;  %5693 = vmatprep.mubr.msk.bf16.mxu0 %vm5996_vm1, %v5995_v7 }
 0xe28   : > { %v4233_v42 = vpack.c.bf16 %v4225_v53, %v4225_v53 }
 0xe29   : > { %v3586_v44 = vrot.slane %v3578_v33, %v6168_v37  ;;  %v3593_v9 = vrot.slane %v3579_v18, %v6168_v37  ;;  %v5914_v19 = vpop.eup %5913 }
 0xe2a   : > { %5688 = vmatmul.mubr.msk.bf16.vlgmr.msra.gmra.mrb[64].mxu1 %vm1409_vm2, %v4233_v42  ;;  %v4226_v8 = vmul.f32 %v5914_v19, %v6904_v62 }
 0xe2b   : > { %v3594_v54 = vcombine.low %v3570_v12, %v3586_v44  ;;  %v3595_v45 = vcombine.high %v3570_v12, %v3586_v44  ;;  %v3610_v23 = vcombine.low %v3577_v25, %v3593_v9  ;;  %v3611_v35 = vcombine.high %v3577_v25, %v3593_v9  ;;  %5699 = vmatprep.mubr.msk.bf16.mxu1 %vm5996_vm1, %v5995_v7 }
 0xe2c   : > { %v4234_v61 = vpack.c.bf16 %v4226_v8, %v4226_v8 }
 0xe2d   : > { %v3602_v26 = vrot.slane %v3594_v54, %v6174_v43  ;;  %v3609_v6 = vrot.slane %v3595_v45, %v6174_v43  ;;  %v3618_v52 = vrot.slane %v3610_v23, %v6174_v43  ;;  %v3625_v56 = vrot.slane %v3611_v35, %v6174_v43  ;;  %v5916_v1 = vpop.eup %5915 }
 0xe2e   : > { %v4227_v17 = vmul.f32 %v5916_v1, %v6908_v3 }
 0xe2f   : > { %v3698_v58 = vcombine.low %v3602_v26, %v3609_v6  ;;  %v5329_v39 = vcombine.high %v3602_v26, %v3609_v6  ;;  %v3714_v5 = vcombine.low %v3618_v52, %v3625_v56  ;;  %v5330_v48 = vcombine.high %v3618_v52, %v3625_v56 }
 0xe30   : > { %v4235_v59 = vpack.c.bf16 %v4227_v17, %v4227_v17 }
 0xe31   : > { %v3705_v55 = vrot.slane %v3698_v58, %v6168_v37  ;;  %v3713_v28 = vrot.slane %v5329_v39, %v6168_v37  ;;  %v3721_v10 = vrot.slane %v3714_v5, %v6168_v37  ;;  %v3729_v2 = vrot.slane %v5330_v48, %v6168_v37 }
 0xe33   : > { %v3730_v21 = vcombine.low %v3705_v55, %v3713_v28  ;;  %v3746_v32 = vcombine.low %v3721_v10, %v3729_v2  ;;  %v3731_v60 = vcombine.high %v3705_v55, %v3713_v28  ;;  %v3747_v63 = vcombine.high %v3721_v10, %v3729_v2 }
 0xe35   : > { %v3738_v36 = vrot.slane %v3730_v21, %v6174_v43  ;;  %v3754_v13 = vrot.slane %v3746_v32, %v6174_v43  ;;  %v3745_v29 = vrot.slane %v3731_v60, %v6174_v43  ;;  %v3761_v57 = vrot.slane %v3747_v63, %v6174_v43 }
 0xe37   : > { %v3762_v16 = vcombine.low %v3738_v36, %v3754_v13  ;;  %v3763_v4 = vcombine.high %v3738_v36, %v3754_v13  ;;  %v3764_v51 = vcombine.low %v3745_v29, %v3761_v57  ;;  %v3765_v41 = vcombine.high %v3745_v29, %v3761_v57 }
 0xe39   : > { %v3770_v20 = vpack.c.bf16 %v3762_v16, %v3762_v16  ;;  %v3771_v38 = vpack.c.bf16 %v3763_v4, %v3763_v4  ;;  %v3772_v22 = vpack.c.bf16 %v3764_v51, %v3764_v51  ;;  %v3773_v30 = vpack.c.bf16 %v3765_v41, %v3765_v41 }
 0xe3b   : > { %v4426_v34 = vsel %vm1877_vm3, %v3770_v20, 0  ;;  %v4472_v15 = vsel %vm1877_vm3, %v3771_v38, 0  ;;  %v4518_v62 = vsel %vm1877_vm3, %v3772_v22, 0  ;;  %v4564_v3 = vsel %vm1877_vm3, %v3773_v30, 0 }
 0xe3c   : > { %5692 = vmatpush3.bf16.msra.mxu0 %v4426_v34  ;;  %5698 = vmatpush3.bf16.msra.mxu1 %v4472_v15 }
 0xe3d   : > { %5703 = vmatprep.subr.bf16.mxu0 %v5995_v7  ;;  %5709 = vmatprep.subr.bf16.mxu1 %v5995_v7 }
 0xe3f   : > { %5694 = vmatmul.mubr.msk.bf16.vlgmr.msra.gmra.mrb[64].mxu0 %vm1409_vm2, %v4234_v61  ;;  %5700 = vmatmul.mubr.msk.bf16.vlgmr.msra.gmra.mrb[68].mxu1 %vm1409_vm2, %v4235_v59 }
 0xe40   : > { %5704 = vmatpush3.bf16.msra.mxu0 %v4518_v62  ;;  %5710 = vmatpush3.bf16.msra.mxu1 %v4564_v3 }
 0xe41   : > { %5711 = vmatprep.mubr.msk.bf16.mxu1 %vm5996_vm1, %v5995_v7  ;;  %5705 = vmatprep.mubr.msk.bf16.mxu0 %vm5996_vm1, %v5995_v7 }
 0xe42   : > { %5715 = vmatprep.subr.bf16.mxu0 %v5995_v7  ;;  %5723 = vmatprep.subr.bf16.mxu1 %v5995_v7 }
 0xe53   : > { %v4213_v14 = vpop.xlane.xlu1 %4212 }
 0xe54   : > { %5917 = vrcp.f32 %v4213_v14 }
 0xe57   : > { %v4210_v24 = vpop.xlane.xlu0 %4209 }
 0xe58   : > { %5919 = vrcp.f32 %v4210_v24 }
 0xe5e   : > { %v5918_v31 = vpop.eup %5917 }
 0xe5f   : > { %v4229_v47 = vmul.f32 %v5918_v31, %v6941_v27 }
 0xe61   : > { %v4237_v46 = vpack.c.bf16 %v4229_v47, %v4229_v47 }
 0xe62   : > { %v5920_v53 = vpop.eup %5919 }
 0xe63   : > { %v4228_v49 = vmul.f32 %v5920_v53, %v6945_v0  ;;  %5712 = vmatmul.mubr.msk.bf16.vlgmr.msra.gmra.mrb[72].mxu1 %vm1409_vm2, %v4237_v46 }
 0xe64   : > { %5727 = vmatprep.mubr.msk.bf16.mxu1 %vm5996_vm1, %v5995_v7 }
 0xe65   : > { %v4236_v50 = vpack.c.bf16 %v4228_v49, %v4228_v49 }
 0xe67   : > { %5706 = vmatmul.mubr.msk.bf16.vlgmr.msra.gmra.mrb[68].mxu0 %vm1409_vm2, %v4236_v50 }
 0xe68   : > { %5719 = vmatprep.mubr.msk.bf16.mxu0 %vm5996_vm1, %v5995_v7 }
 0xef1   : > { %v4278_v33 = vpop.f32.mrb[56].mxu0 }
 0xef2   : > { %v4324_v18 = vpop.f32.mrb[60].mxu1  ;;  %v5671_v42 = vpop.f32.mrb[57].mxu0 }
 0xef3   : > { %v5677_v12 = vpop.f32.mrb[61].mxu1  ;;  %v4281_v27 = vpop.f32.mrb[58].mxu0 }
 0xef4   : > { %v4327_v25 = vpop.f32.mrb[62].mxu1  ;;  %v5672_v44 = vpop.f32.mrb[59].mxu0 }
 0xef5   : > { %v5678_v9 = vpop.f32.mrb[63].mxu1 }
 0xef9   : > { %v4370_v0 = vpop.f32.mrb[60].mxu0 }
 0xefa   : > { %v4606_v54 = vcombine.low %v4278_v33, %v4370_v0  ;;  %v4607_v45 = vcombine.high %v4278_v33, %v4370_v0  ;;  %v5683_v23 = vpop.f32.mrb[61].mxu0 }
 0xefb   : > { %v4373_v35 = vpop.f32.mrb[62].mxu0 }
 0xefc   : > { %v5684_v26 = vpop.f32.mrb[63].mxu0  ;;  %v4614_v5 = vrot.slane %v4606_v54, %v6168_v37  ;;  %v4621_v48 = vrot.slane %v4607_v45, %v6168_v37 }
 0xefd   : > { %v4416_v6 = vpop.f32.mrb[64].mxu1 }
 0xefe   : > { %v4622_v52 = vcombine.low %v4324_v18, %v4416_v6  ;;  %v4623_v56 = vcombine.high %v4324_v18, %v4416_v6  ;;  %v5689_v58 = vpop.f32.mrb[65].mxu1 }
 0xeff   : > { %v4419_v39 = vpop.f32.mrb[66].mxu1 }
 0xf00   : > { %v4630_v55 = vrot.slane %v4622_v52, %v6168_v37  ;;  %v4637_v28 = vrot.slane %v4623_v56, %v6168_v37  ;;  %v5690_v10 = vpop.f32.mrb[67].mxu1 }
 0xf02   : > { %v4638_v2 = vcombine.low %v4614_v5, %v4630_v55  ;;  %v4639_v21 = vcombine.high %v4614_v5, %v4630_v55  ;;  %v4654_v32 = vcombine.low %v4621_v48, %v4637_v28  ;;  %v4655_v60 = vcombine.high %v4621_v48, %v4637_v28 }
 0xf04   : > { %v4646_v63 = vrot.slane %v4638_v2, %v6174_v43  ;;  %v4653_v19 = vrot.slane %v4639_v21, %v6174_v43  ;;  %v4662_v36 = vrot.slane %v4654_v32, %v6174_v43  ;;  %v4669_v13 = vrot.slane %v4655_v60, %v6174_v43 }
 0xf06   : > { %v4742_v29 = vcombine.low %v4646_v63, %v4653_v19  ;;  %v5347_v57 = vcombine.high %v4646_v63, %v4653_v19  ;;  %v4758_v1 = vcombine.low %v4662_v36, %v4669_v13  ;;  %v5348_v16 = vcombine.high %v4662_v36, %v4669_v13  ;;  %v5837_v19 = vld [vmem:[%s7174_s5 + $0x10] sm:$0xff]  }
 0xf07   : > { %5716 = vmatpush3.bf16.msra.mxu0 %v5837_v19 }
 0xf08   : > { %v4749_v4 = vrot.slane %v4742_v29, %v6168_v37  ;;  %v4757_v51 = vrot.slane %v5347_v57, %v6168_v37  ;;  %v4765_v41 = vrot.slane %v4758_v1, %v6168_v37  ;;  %v4773_v8 = vrot.slane %v5348_v16, %v6168_v37  ;;  %5717 = vmatprep.subr.bf16.mxu0 %v5995_v7 }
 0xf0a   : > { %v4775_v17 = vcombine.high %v4749_v4, %v4757_v51  ;;  %v4791_v20 = vcombine.high %v4765_v41, %v4773_v8  ;;  %v4774_v38 = vcombine.low %v4749_v4, %v4757_v51  ;;  %v4790_v34 = vcombine.low %v4765_v41, %v4773_v8 }
 0xf0c   : > { %v7022_v15 = vrot.slane %v4775_v17, %v6174_v43  ;;  %v7025_v22 = vrot.slane %v4791_v20, %v6174_v43  ;;  %v7028_v30 = vrot.slane %v4774_v38, %v6174_v43  ;;  %v7031_v61 = vrot.slane %v4790_v34, %v6174_v43  ;;  %v5838_v38 = vld [vmem:[%s7174_s5 + $0x18] sm:$0xff]  }
 0xf0d   : > { %5718 = vmatpush3.bf16.msra.mxu0 %v5838_v38 }
 0xf0e   : > { %v4808_v59 = vcombine.low %v7022_v15, %v7025_v22  ;;  %v4806_v62 = vcombine.low %v7028_v30, %v7031_v61  ;;  %v4807_v3 = vcombine.high %v7028_v30, %v7031_v61  ;;  %v4809_v14 = vcombine.high %v7022_v15, %v7025_v22  ;;  %5731 = vmatprep.subr.bf16.mxu0 %v5995_v7 }
 0xf12   : > { %v4462_v24 = vpop.f32.mrb[64].mxu0  ;;  %v4508_v31 = vpop.f32.mrb[68].mxu1 }
 0xf13   : > { %v5695_v47 = vpop.f32.mrb[65].mxu0  ;;  %v5701_v46 = vpop.f32.mrb[69].mxu1 }
 0xf14   : > { %v4465_v53 = vpop.f32.mrb[66].mxu0  ;;  %v4511_v49 = vpop.f32.mrb[70].mxu1 }
 0xf15   : > { %v5696_v50 = vpop.f32.mrb[67].mxu0  ;;  %v5702_v33 = vpop.f32.mrb[71].mxu1 }
 0xf36   : > { %v4600_v18 = vpop.f32.mrb[72].mxu1 }
 0xf37   : > { %v4690_v42 = vcombine.low %v4508_v31, %v4600_v18  ;;  %v4691_v12 = vcombine.high %v4508_v31, %v4600_v18  ;;  %v5713_v27 = vpop.f32.mrb[73].mxu1 }
 0xf38   : > { %v4603_v25 = vpop.f32.mrb[74].mxu1 }
 0xf39   : > { %v5714_v44 = vpop.f32.mrb[75].mxu1  ;;  %v4698_v35 = vrot.slane %v4690_v42, %v6168_v37  ;;  %v4705_v26 = vrot.slane %v4691_v12, %v6168_v37 }
 0xf3a   : > { %v4554_v9 = vpop.f32.mrb[68].mxu0 }
 0xf3b   : > { %v4674_v0 = vcombine.low %v4462_v24, %v4554_v9  ;;  %v4675_v54 = vcombine.high %v4462_v24, %v4554_v9  ;;  %v5707_v45 = vpop.f32.mrb[69].mxu0 }
 0xf3c   : > { %v4557_v23 = vpop.f32.mrb[70].mxu0 }
 0xf3d   : > { %v4682_v6 = vrot.slane %v4674_v0, %v6168_v37  ;;  %v4689_v52 = vrot.slane %v4675_v54, %v6168_v37  ;;  %v5708_v56 = vpop.f32.mrb[71].mxu0 }
 0xf3e   : > { %v5842_v56 = vld [vmem:[%s7177_s8 + $0x28] sm:$0xff]  }
 0xf3f   : > { %v4706_v58 = vcombine.low %v4682_v6, %v4698_v35  ;;  %v4707_v39 = vcombine.high %v4682_v6, %v4698_v35  ;;  %v4722_v5 = vcombine.low %v4689_v52, %v4705_v26  ;;  %v4723_v48 = vcombine.high %v4689_v52, %v4705_v26  ;;  %v5839_v52 = vld [vmem:[%s7176_s7 + $0x10] sm:$0xff]  }
 0xf40   : > { %5724 = vmatpush3.bf16.msra.mxu1 %v5839_v52 }
 0xf41   : > { %v4714_v55 = vrot.slane %v4706_v58, %v6174_v43  ;;  %v4721_v28 = vrot.slane %v4707_v39, %v6174_v43  ;;  %v4730_v10 = vrot.slane %v4722_v5, %v6174_v43  ;;  %v4737_v2 = vrot.slane %v4723_v48, %v6174_v43  ;;  %5725 = vmatprep.subr.bf16.mxu1 %v5995_v7 }
 0xf43   : > { %v4810_v21 = vcombine.low %v4714_v55, %v4721_v28  ;;  %v5349_v32 = vcombine.high %v4714_v55, %v4721_v28  ;;  %v4826_v60 = vcombine.low %v4730_v10, %v4737_v2  ;;  %v5350_v63 = vcombine.high %v4730_v10, %v4737_v2 }
 0xf45   : > { %v4817_v36 = vrot.slane %v4810_v21, %v6168_v37  ;;  %v4825_v13 = vrot.slane %v5349_v32, %v6168_v37  ;;  %v4833_v29 = vrot.slane %v4826_v60, %v6168_v37  ;;  %v4841_v57 = vrot.slane %v5350_v63, %v6168_v37  ;;  %v5359_v32 = vld [vmem:[%s7175_s6 + $0x1] ss:$0 sm:$0xff] }
 0xf47   : > { %v4843_v1 = vcombine.high %v4817_v36, %v4825_v13  ;;  %v4859_v16 = vcombine.high %v4833_v29, %v4841_v57  ;;  %v4842_v4 = vcombine.low %v4817_v36, %v4825_v13  ;;  %v4858_v51 = vcombine.low %v4833_v29, %v4841_v57  ;;  %v5843_v13 = vld [vmem:[%s7177_s8 + $0x30] sm:$0xff]   ;;  %v5844_v29 = vld [vmem:[%s7177_s8 + $0x38] sm:$0xff]  }
 0xf49   : > { %v4857_v41 = vrot.slane %v4843_v1, %v6174_v43  ;;  %v4873_v8 = vrot.slane %v4859_v16, %v6174_v43  ;;  %v4850_v17 = vrot.slane %v4842_v4, %v6174_v43  ;;  %v4866_v20 = vrot.slane %v4858_v51, %v6174_v43 }
 0xf4b   : > { %v4876_v37 = vcombine.low %v4857_v41, %v4873_v8  ;;  %v4875_v34 = vcombine.high %v4850_v17, %v4866_v20  ;;  %v4874_v15 = vcombine.low %v4850_v17, %v4866_v20  ;;  %v4877_v22 = vcombine.high %v4857_v41, %v4873_v8 }
 0xf4d   : > { %v5815_v24 = vpack.i.bf16 %v4876_v37, %v4808_v59  ;;  %v5810_v31 = vpack.i.bf16 %v4875_v34, %v4807_v3  ;;  %v5820_v47 = vpack.i.bf16 %v4877_v22, %v4809_v14 }
 0xf4f   : > { %5816 = vrot.lane.b32.xlu1 %v5815_v24, %s6004_s25  ;;  %5811 = vrot.lane.b32.xlu0 %v5810_v31, %s7194_s12 }
 0xf53   : > { %5821 = vrot.lane.b32.xlu0 %v5820_v47, %s7195_s26  ;;  %s367_s26 = scalar_lea.vmem [#allocation2], %s5258_s28 }
 0xf54   : > { %s5183_s25 = sshll.u32 %s367_s26, 4  ;;  %s7124_s25 = int_to_ptr.vmem [resolvable:$true] %s5183_s25 }
 0xf55   : > { %s5931_s28 = scalar_lea.vmem %s7124_s25, 256  ;;  %p5938_p0 = scmp.lt.s32.totalorder %s7124_s25, %s5936_s21 }
 0xf56   : > { %p5932_p11 = scmp.ne.s32.totalorder %s7124_s25, %s5931_s28  ;;  %p5939_p1 = scmp.lt.s32.totalorder %s5937_s30, %s5931_s28 }
 0xf58   : > { %p5933_p12 = pnand %p5932_p11, %p6102_p5  ;;  %p5940_p2 = por %p5939_p1, %p5938_p0 }
 0xf5a   : > { %p5934_p13 = pneg %p5933_p12 }
 0xf5c   : > { %p5941_p3 = pnand %p5940_p2, %p5934_p13 }
 0xfc1   : > { %v5817_v43 = vpop.permute.xlu1 %5816  ;;  %v5812_v46 = vpop.permute.xlu0 %5811 }
 0xfc2   : > { %v5814_v53 = vunpack.i.h.bf16 %v5812_v46  ;;  %v5813_v49 = vunpack.i.l.bf16 %v5812_v46  ;;  %v5819_v50 = vunpack.i.h.bf16 %v5817_v43  ;;  %v5818_v33 = vunpack.i.l.bf16 %v5817_v43 }
 0xfc4   : > { %v4902_v18 = vsel %vm1409_vm2, %v4806_v62, %v5813_v49  ;;  %v4903_v59 = vsel %vm1409_vm2, %v4874_v15, %v5814_v53 }
 0xfc5   : > { %v5822_v3 = vpop.permute.xlu0 %5821  ;;  %v4904_v12 = vsel %vm2541_vm4, %v4902_v18, %v5818_v33  ;;  %v4905_v27 = vsel %vm2541_vm4, %v4903_v59, %v5819_v50  ;;  %v5380_v18 = vld [vmem:[%s7178_s9] ss:$0 sm:$0xff] }
 0xfc6   : > { %v5824_v14 = vunpack.i.h.bf16 %v5822_v3  ;;  %v5823_v42 = vunpack.i.l.bf16 %v5822_v3 }
 0xfc8   : > { %v4906_v25 = vsel %vm2544_vm5, %v4904_v12, %v5823_v42  ;;  %v4907_v44 = vsel %vm2544_vm5, %v4905_v27, %v5824_v14 }
 0xfc9   : > { %v4908_v9 = vpack.c.bf16 %v4907_v44, %v4906_v25 }
 0xfcb   : > { %5720 = vmatmul.mubr.msk.bf16.vlgmr.msra.gmra.mrb[72].mxu0 %vm416_vm0, %v4908_v9 }
 0xfcc   : > { %5739 = vmatprep.mubr.msk.bf16.mxu0 %vm5996_vm1, %v5995_v7 }
0x109e   : > { %v4963_v30 = vpop.f32.mrb[72].mxu0 }
0x109f   : > { %v4970_v61 = vadd.f32 %v4963_v30, %v6631_v40  ;;  %v5721_v62 = vpop.f32.mrb[73].mxu0  ;;  %v5840_v40 = vld [vmem:[%s7176_s7 + $0x18] sm:$0xff]  }
0x10a0   : > { %v4966_v0 = vpop.f32.mrb[74].mxu0  ;;  %5726 = vmatpush3.bf16.msra.mxu1 %v5840_v40 }
0x10a1   : > { %v4971_v54 = vadd.f32 %v4966_v0, %v6633_v11  ;;  %v5722_v45 = vpop.f32.mrb[75].mxu0  ;;  %v4974_v23 = vmul.f32 %v4970_v61, %v4970_v61  ;;  %v5841_v11 = vld [vmem:[%s7177_s8 + $0x20] sm:$0xff]  }
0x10a2   : > { %5732 = vmatpush3.bf16.msra.mxu0 %v5841_v11 }
0x10a3   : > { %v4976_v35 = vsel %vm416_vm0, %v4974_v23, 0.0  ;;  %v4975_v26 = vmul.f32 %v4971_v54, %v4971_v54  ;;  %5733 = vmatprep.subr.bf16.mxu0 %v5995_v7 }
0x10a4   : > { %4977 = vadd.xlane.f32.xlu1 %v4976_v35 }
0x10a5   : > { %v4979_v6 = vsel %vm416_vm0, %v4975_v26, 0.0 }
0x10a6   : > { %4980 = vadd.xlane.f32.xlu0 %v4979_v6  ;;  %5734 = vmatpush3.bf16.msra.mxu0 %v5842_v56 }
0x10a7   : > { %5735 = vmatprep.subr.bf16.mxu0 %v5995_v7 }
0x10aa   : > { %5736 = vmatpush3.bf16.msra.mxu0 %v5843_v13 }
0x10ab   : > { %5737 = vmatprep.subr.bf16.mxu0 %v5995_v7 }
0x10ae   : > { %5738 = vmatpush3.bf16.msra.mxu0 %v5844_v29 }
0x1131   : > { %v4978_v58 = vpop.xlane.xlu1 %4977 }
0x1132   : > { %v4982_v39 = vmul.f32 0.03125, %v4978_v58 }
0x1133   : > { %v4981_v5 = vpop.xlane.xlu0 %4980 }
0x1134   : > { %v4984_v48 = vadd.f32 1e-06, %v4982_v39  ;;  %v4983_v55 = vmul.f32 0.03125, %v4981_v5 }
0x1136   : > { %5921 = vrsqrt.f32 %v4984_v48  ;;  %v4985_v28 = vadd.f32 1e-06, %v4983_v55 }
0x1138   : > { %5923 = vrsqrt.f32 %v4985_v28 }
0x1140   : > { %v5922_v10 = vpop.eup %5921 }
0x1141   : > { %v4988_v2 = vmul.f32 %v5922_v10, %v4970_v61 }
0x1142   : > { %v5924_v21 = vpop.eup %5923 }
0x1143   : > { %v4989_v60 = vmul.f32 %v5924_v21, %v4971_v54  ;;  %v4996_v63 = vmul.f32 %v5359_v32, %v4988_v2 }
0x1145   : > { %v4997_v19 = vmul.f32 %v5359_v32, %v4989_v60 }
0x1147   : > { %v4998_v36 = vpack.c.bf16 %v4997_v19, %v4996_v63 }
0x1149   : > { %5728 = vmatmul.mubr.msk.bf16.vlgmr.msra.gmra.mrb[76].mxu1 %vm416_vm0, %v4998_v36 }
0x121c   : > { %v5053_v57 = vpop.f32.mrb[76].mxu1 }
0x121d   : > { %v5729_v1 = vpop.f32.mrb[77].mxu1  ;;  %v5060_v4 = vmax.f32 %v5053_v57, 0.0 }
0x121e   : > { %v5056_v16 = vpop.f32.mrb[78].mxu1 }
0x121f   : > { %v5061_v51 = vmax.f32 %v5056_v16, 0.0  ;;  %v5730_v41 = vpop.f32.mrb[79].mxu1 }
0x1221   : > { %v5062_v8 = vpack.c.bf16 %v5061_v51, %v5060_v4 }
0x1223   : > { %5740 = vmatmul.mubr.msk.bf16.vlgmr.msra.gmra.mrb[76].mxu0 %vm2731_vm6, %v5062_v8 }
0x12f6   : > { %v5133_v17 = vpop.f32.mrb[76].mxu0 }
0x12f7   : > { %v5140_v20 = vadd.f32 %v5133_v17, %v4970_v61  ;;  %v5741_v38 = vpop.f32.mrb[77].mxu0 }
0x12f8   : > { %v5136_v37 = vpop.f32.mrb[78].mxu0 }
0x12f9   : > { %v5141_v34 = vadd.f32 %v5136_v37, %v4971_v54  ;;  %v5742_v7 = vpop.f32.mrb[79].mxu0  ;;  %v5143_v15 = vmul.f32 %v5140_v20, %v5140_v20 }
0x12fb   : > { %v5145_v22 = vsel %vm416_vm0, %v5143_v15, 0.0  ;;  %v5144_v24 = vmul.f32 %v5141_v34, %v5141_v34 }
0x12fc   : > { %5146 = vadd.xlane.f32.xlu0 %v5145_v22 }
0x12fd   : > { %v5148_v31 = vsel %vm416_vm0, %v5144_v24, 0.0 }
0x12fe   : > { %5149 = vadd.xlane.f32.xlu1 %v5148_v31 }
0x1389   : > { %v5147_v47 = vpop.xlane.xlu0 %5146 }
0x138a   : > { %v5151_v43 = vmul.f32 0.03125, %v5147_v47 }
0x138b   : > { %v5150_v46 = vpop.xlane.xlu1 %5149 }
0x138c   : > { %v5153_v53 = vadd.f32 1e-06, %v5151_v43  ;;  %v5152_v49 = vmul.f32 0.03125, %v5150_v46 }
0x138e   : > { %5925 = vrsqrt.f32 %v5153_v53  ;;  %v5154_v50 = vadd.f32 1e-06, %v5152_v49 }
0x1390   : > { %5927 = vrsqrt.f32 %v5154_v50 }
0x1398   : > { %v5926_v33 = vpop.eup %5925 }
0x1399   : > { %v5157_v59 = vmul.f32 %v5926_v33, %v5140_v20 }
0x139a   : > { %v5928_v3 = vpop.eup %5927 }
0x139b   : > { %v5165_v14 = vmul.f32 %v5380_v18, %v5157_v59  ;;  %v5158_v42 = vmul.f32 %v5928_v3, %v5141_v34 }
0x139d   : > { %v5166_v12 = vmul.f32 %v5380_v18, %v5158_v42  ;;  %5167 = vst.msk [vmem:[%s367_s26] sm:$0xff] %vm416_vm0, %v5165_v14 }
0x139f   : > { %5168 = vst.msk [vmem:[%s367_s26 + $0x8] sm:$0xff] %vm416_vm0, %v5166_v12 }
0x13a0   : > { %5944 = shalt.err (!%p5941_p3)
}
0x13a1   : > { %s5945_s29 = scalar_lea.hbm %s7121_s20, 256  ;;  %s5949_s18 = scalar_lea.hbm %s7179_s10, 512 }
0x13a2   : > { %p5946_p4 = scmp.ne.s32.totalorder %s7121_s20, %s5945_s29  ;;  %p5950_p9 = scmp.lt.u32.totalorder %s7121_s20, %s7179_s10 }
0x13a3   : > { %p5951_p10 = scmp.lt.u32.totalorder %s5949_s18, %s5945_s29  ;;  %p5953_p12 = scmp.lt.u32.totalorder %s5945_s29, %s7121_s20 }
0x13a4   : > { %p5947_p7 = pnand %p5946_p4, %p6102_p5 }
0x13a5   : > { %p5952_p11 = por %p5951_p10, %p5950_p9 }
0x13a6   : > { %p5948_p8 = pneg %p5947_p7 }
0x13a7   : > { %p5954_p13 = por %p5953_p12, %p5952_p11 }
0x13a9   : > { %p5955_p0 = pnand %p5954_p13, %p5948_p8 }
0x13ab   : > { %5958 = shalt.err (!%p5955_p0)
}
0x13ac   : > { %s6008_s28 = smov 128  }
0x13ad   : > { %5743 = dma.vmem_to_hbm [thread:$0]  (%p6102_p5), %s7124_s25, 256, %s7121_s20, %s7127_s17, %s6008_s28, %s6008_s28, %s7194_s12  }
0x13ae PF: > { %p5749_p1 = scmp.ge.s32.totalorder %s5993_s16, 2  ;;  %s5198_s30 = sand.u32 1, %s5981_s13  }
0x13af   : > { %s5199_s29 = scalar_lea.sflag [#allocation3], %s5198_s30 }
0x13b0   : > { %p5746_p2 = pnand %p5749_p1, %p6106_p6 }
0x13b2   : > { %5976 = dma.done.wait (!%p5746_p2), %s5199_s29, 256  }
0x13b3   : > { %5978 = vsyncadd (!%p5746_p2), %s5199_s29, 4294967040  ;;  %p20_p3 = scmp.ge.s32.totalorder %s6089_s19, 4   ;;  %s7196_s13 = smov %s5985_s14 }
0x13b4   : > { %s7197_s14 = smov %s5989_s15  ;;  %s7198_s15 = smov %s6100_s22 }
0x13b5   : > { %s7199_s16 = smov %s6089_s19  ;;  %22 = sbr.rel (!%p20_p3) target bundleno = 3 (0x3), region = 104 }
0x13bc   :  { %5204 = vsyncpa [#allocation3], 1 }
0x13bd   :  { %5206 = vsyncpa [#allocation3 + $0x1], 1 }

</bundles_post_ra>
